<compile_context>
chip_gen: v7x
topology: tpu7x:2x2x1
jax: 0.10.0
libtpu: 0.0.40
codegen_flags: <defaults>
</compile_context>

<pallas_src>
import math
import functools

import jax
import jax.numpy as jnp
from jax.experimental import pallas as pl
from jax.experimental.pallas import tpu as pltpu


EXPANSION = 4


# --------------------------------- helpers ---------------------------------

def _round_up(x, m):
    return (x + m - 1) // m * m


def _pad_to(x, shape):
    pads = [(0, t - s) for s, t in zip(x.shape, shape)]
    if all(p == (0, 0) for p in pads):
        return x
    return jnp.pad(x, pads)


def _tpu_generation():
    """5 / 6 / 7 from the device kind string (defaults to 6)."""
    try:
        kind = jax.devices()[0].device_kind.lower()
    except Exception:
        return 6
    if "v5" in kind:
        return 5
    if "v6" in kind:
        return 6
    if "v7" in kind or "7x" in kind:
        return 7
    return 6


def _pick_tn(np_, gen):
    # v5e MXU is 128-wide; v6e/v7x prefer 256-wide N when it divides.
    if gen <= 5:
        return 128
    return 256 if np_ % 256 == 0 else 128


def _pick_tm(m, tn, gen, n_col_tiles=1):
    """Largest divisor of m that is a multiple of 8 keeping the f32 tile <=~128KiB.
    Only on v7x (2 TensorCores) shrink to create >= 2 parallel tiles."""
    cap = max(16, min(512, (128 * 1024) // (4 * tn)))
    tm = None
    for t in range(min(cap, m), 7, -1):
        if t % 8 == 0 and m % t == 0:
            tm = t
            break
    if tm is None:
        return None
    if gen >= 7 and (m // tm) * n_col_tiles < 2:
        for t in range(tm // 2, 15, -1):
            if t % 8 == 0 and m % t == 0:
                return t
    return tm


def _fold_bn(w, bn, eps=1e-5):
    """Fold the BN scale into the conv weight (last axis = Cout); return (w', shift)."""
    scale = bn['gamma'] / jnp.sqrt(bn['var'] + eps)
    shift = bn['beta'] - bn['mean'] * scale
    return w * scale, shift


# ----------------------- fused conv-matmul Pallas kernels -----------------------

def _epilogue(y, shift_ref, res_ref, relu):
    y = y + shift_ref[...]
    if res_ref is not None:
        y = y + res_ref[...].astype(jnp.float32)
    if relu:
        y = jnp.maximum(y, 0.0)
    return y


def _mm1_kernel(a_ref, w_ref, shift_ref, *rest, relu, has_res):
    """Single K block: out = relu?(A @ W + shift (+res)); bf16 store, no scratch."""
    if has_res:
        res_ref, o_ref = rest
    else:
        res_ref = None
        (o_ref,) = rest
    y = jnp.dot(a_ref[...], w_ref[...], preferred_element_type=jnp.float32)
    o_ref[...] = _epilogue(y, shift_ref, res_ref, relu).astype(o_ref.dtype)


def _mmk_kernel(a_ref, w_ref, shift_ref, *rest, relu, has_res, nk):
    """Multi K block: f32 VMEM scratch accumulator, bf16 store in the epilogue."""
    if has_res:
        res_ref, o_ref, acc_ref = rest
    else:
        res_ref = None
        o_ref, acc_ref = rest
    k = pl.program_id(2)
    part = jnp.dot(a_ref[...], w_ref[...], preferred_element_type=jnp.float32)

    @pl.when(k == 0)
    def _():
        acc_ref[...] = part

    @pl.when(k > 0)
    def _():
        acc_ref[...] = acc_ref[...] + part

    @pl.when(k == nk - 1)
    def _():
        o_ref[...] = _epilogue(acc_ref[...], shift_ref, res_ref, relu
                               ).astype(o_ref.dtype)


def fused_matmul_bn(a, w, shift, *, relu, residual=None, gen):
    """a: (M, K) bf16, w: (K, Np) bf16 (BN scale pre-folded), shift: (1, Np) f32,
    residual: optional (M, Np) bf16.  Returns bf16 (M, Np)."""
    M, K = a.shape
    Np = w.shape[1]
    # TODO(synk): general M / N padding path (never needed for this block's shapes).
    assert M % 8 == 0 and Np % 128 == 0

    tn = _pick_tn(Np, gen)
    tm = _pick_tm(M, tn, gen, Np // tn)
    assert tm is not None

    if K <= 2048:                         # single un-padded K block (common case here)
        tk, Kp = K, K
    else:
        tk = 512                          # multiple of 256 for v6e/v7x MXU
        Kp = _round_up(K, tk)
        a = jnp.pad(a, ((0, 0), (0, Kp - K)))
        w = jnp.pad(w, ((0, Kp - K), (0, 0)))
    nk = Kp // tk

    has_res = residual is not None
    inputs = [a, w, shift] + ([residual] if has_res else [])

    if nk == 1:
        in_specs = [pl.BlockSpec((tm, tk), lambda i, j: (i, 0)),
                    pl.BlockSpec((tk, tn), lambda i, j: (0, j)),
                    pl.BlockSpec((1, tn), lambda i, j: (0, j))]
        if has_res:
            in_specs.append(pl.BlockSpec((tm, tn), lambda i, j: (i, j)))
        return pl.pallas_call(
            functools.partial(_mm1_kernel, relu=relu, has_res=has_res),
            out_shape=jax.ShapeDtypeStruct((M, Np), jnp.bfloat16),
            grid_spec=pltpu.PrefetchScalarGridSpec(
                num_scalar_prefetch=0,
                grid=(M // tm, Np // tn),
                in_specs=in_specs,
                out_specs=pl.BlockSpec((tm, tn), lambda i, j: (i, j))),
            compiler_params=pltpu.CompilerParams(
                dimension_semantics=("parallel", "parallel")),
        )(*inputs)

    in_specs = [pl.BlockSpec((tm, tk), lambda i, j, k: (i, k)),
                pl.BlockSpec((tk, tn), lambda i, j, k: (k, j)),
                pl.BlockSpec((1, tn), lambda i, j, k: (0, j))]
    if has_res:
        in_specs.append(pl.BlockSpec((tm, tn), lambda i, j, k: (i, j)))
    return pl.pallas_call(
        functools.partial(_mmk_kernel, relu=relu, has_res=has_res, nk=nk),
        out_shape=jax.ShapeDtypeStruct((M, Np), jnp.bfloat16),
        grid_spec=pltpu.PrefetchScalarGridSpec(
            num_scalar_prefetch=0,
            grid=(M // tm, Np // tn, nk),
            in_specs=in_specs,
            out_specs=pl.BlockSpec((tm, tn), lambda i, j, k: (i, j)),
            scratch_shapes=[pltpu.VMEM((tm, tn), jnp.float32)]),
        compiler_params=pltpu.CompilerParams(
            dimension_semantics=("parallel", "parallel", "arbitrary")),
    )(*inputs)


# --------------------------- folded 3x3 conv kernel ---------------------------

def _conv3x3_kernel(xflat_ref, w_ref, shift_ref, o_ref, *, wpad, tm, relu):
    """9 shifted-window matmuls over ONE padded, flattened activation resident in
    VMEM (no im2col).  Tap t=(ky,kx) reads rows [base + ky*wpad + kx, +tm)."""
    base = pl.multiple_of(pl.program_id(1) * tm, 8)
    acc = None
    for t in range(9):
        off = (t // 3) * wpad + (t % 3)
        a = xflat_ref[0, pl.ds(base + off, tm), :]
        p = jnp.dot(a, w_ref[t], preferred_element_type=jnp.float32)
        acc = p if acc is None else acc + p
    y = acc + shift_ref[...]
    if relu:
        y = jnp.maximum(y, 0.0)
    o_ref[0] = y.astype(o_ref.dtype)


# ------------------------------- conv wrappers ---------------------------------

def conv1x1_bn(x, w, bn, *, stride=1, relu=True, residual=None, gen):
    """x: (N,H,W,Cx) bf16 NHWC (channels beyond the weight's Cin are zero pad),
    w: (Cin, Cout) f32.  Returns (N,Ho,Wo,Np) bf16 with Np=round_up(Cout,128);
    padded output lanes are exactly zero (shift padding is zero)."""
    if stride != 1:
        x = x[:, ::stride, ::stride, :]
    N, Ho, Wo, Cx = x.shape
    Cin, Cout = w.shape
    assert Cin <= Cx
    Np = _round_up(Cout, 128)

    wf, shift = _fold_bn(w, bn)
    wf = _pad_to(wf, (Cx, Np)).astype(jnp.bfloat16)
    shift_p = _pad_to(shift, (Np,)).reshape(1, Np).astype(jnp.float32)

    rows = x.reshape(N * Ho * Wo, Cx)
    res2d = None
    if residual is not None:
        assert residual.shape[-1] == Np
        res2d = residual.astype(jnp.bfloat16).reshape(N * Ho * Wo, Np)
    y = fused_matmul_bn(rows, wf, shift_p, relu=relu, residual=res2d, gen=gen)
    return y.reshape(N, Ho, Wo, Np)


def conv3x3_bn(x, w, bn, *, stride=1, relu=True, gen):
    """x: (N,H,W,Cx) bf16 NHWC (channel-padded OK), w: (3,3,Cin,Cout) f32, pad=1."""
    N, H, W, Cx = x.shape
    Cin, Cout = w.shape[2], w.shape[3]
    assert Cin <= Cx
    Np = _round_up(Cout, 128)
    Ho = (H + 2 - 3) // stride + 1
    Wo = (W + 2 - 3) // stride + 1

    wf, shift = _fold_bn(w, bn)
    wf = _pad_to(wf, (3, 3, Cx, Np)).astype(jnp.bfloat16)
    shift_p = _pad_to(shift, (Np,)).reshape(1, Np).astype(jnp.float32)

    xp = jnp.pad(x, ((0, 0), (1, 1), (1, 1), (0, 0)))      # spatial zero pad (bf16)

    tn = _pick_tn(Np, gen)
    wpad = W + 2
    L = Ho * wpad
    tm = _pick_tm(L, tn, gen, Np // tn) if stride == 1 else None

    if stride == 1 and tm is not None:
        # 3x3 taps folded into the kernel: no im2col materialization in HBM.
        Fp = _round_up((H + 2) * wpad + 2, 8)
        xflat = _pad_to(xp.reshape(N, (H + 2) * wpad, Cx), (N, Fp, Cx))
        wt = wf.reshape(9, Cx, Np)
        y = pl.pallas_call(
            functools.partial(_conv3x3_kernel, wpad=wpad, tm=tm, relu=relu),
            out_shape=jax.ShapeDtypeStruct((N, L, Np), jnp.bfloat16),
            grid_spec=pltpu.PrefetchScalarGridSpec(
                num_scalar_prefetch=0,
                grid=(N, L // tm, Np // tn),
                in_specs=[
                    pl.BlockSpec((1, Fp, Cx), lambda n, i, j: (n, 0, 0)),
                    pl.BlockSpec((9, Cx, tn), lambda n, i, j: (0, 0, j)),
                    pl.BlockSpec((1, tn), lambda n, i, j: (0, j)),
                ],
                out_specs=pl.BlockSpec((1, tm, tn), lambda n, i, j: (n, i, j))),
            compiler_params=pltpu.CompilerParams(
                dimension_semantics=("parallel", "parallel", "parallel")),
        )(xflat, wt, shift_p)
        # Valid output columns are wo in [0, Wo); the 2 overcomplete ones are dropped.
        return y.reshape(N, Ho, wpad, Np)[:, :, :Wo, :]

    # TODO(synk): stride>1 falls back to an im2col matmul (strided shifted windows
    # are not expressible as a rectangular BlockSpec window).
    cols = [xp[:, ky:ky + Ho * stride:stride, kx:kx + Wo * stride:stride, :]
            for ky in range(3) for kx in range(3)]
    patches = jnp.concatenate(cols, axis=-1).reshape(N * Ho * Wo, 9 * Cx)
    y = fused_matmul_bn(patches, wf.reshape(9 * Cx, Np), shift_p, relu=relu, gen=gen)
    return y.reshape(N, Ho, Wo, Np)


# ------------------------------ Bottleneck block --------------------------------

def bottleneck_forward(x_nchw, params, *, stride):
    gen = _tpu_generation()
    cout = params['conv3_w'].shape[1]
    np_final = _round_up(cout, 128)

    # NCHW -> NHWC in bf16 (all kernels consume bf16 operands).
    x = jnp.transpose(x_nchw.astype(jnp.bfloat16), (0, 2, 3, 1))

    out = conv1x1_bn(x, params['conv1_w'], params['bn1'], stride=1, relu=True, gen=gen)
    out = conv3x3_bn(out, params['conv2_w'], params['bn2'], stride=stride,
                     relu=True, gen=gen)

    if 'sc_conv_w' in params:
        # TODO(synk): for stride==1 projection shortcuts this matmul could be merged
        # with conv1 (concat along Cout) so x is read from HBM once.
        identity = conv1x1_bn(x, params['sc_conv_w'], params['sc_bn'],
                              stride=stride, relu=False, gen=gen)
    else:
        identity = _pad_to(x, x.shape[:3] + (np_final,))

    # conv3 + bn3 + residual add + final ReLU fused into a single kernel call.
    out = conv1x1_bn(out, params['conv3_w'], params['bn3'], stride=1, relu=True,
                     residual=identity, gen=gen)

    out = out[..., :cout]                         # drop lane padding (no-op if aligned)
    return jnp.transpose(out, (0, 3, 1, 2)).astype(x_nchw.dtype)


# ----------------------------- plain-JAX reference ------------------------------

def _ref_conv(x, w, stride, padding):
    return jax.lax.conv_general_dilated(
        x, w, window_strides=(stride, stride),
        padding=[(padding, padding), (padding, padding)],
        dimension_numbers=('NHWC', 'HWIO', 'NHWC'))


def _ref_bn(x, bn, eps=1e-5):
    scale = bn['gamma'] / jnp.sqrt(bn['var'] + eps)
    shift = bn['beta'] - bn['mean'] * scale
    return x * scale + shift


def bottleneck_ref(x_nchw, params, *, stride):
    x = jnp.transpose(x_nchw, (0, 2, 3, 1)).astype(jnp.float32)
    out = jax.nn.relu(_ref_bn(_ref_conv(x, params['conv1_w'][None, None], 1, 0),
                              params['bn1']))
    out = jax.nn.relu(_ref_bn(_ref_conv(out, params['conv2_w'], stride, 1),
                              params['bn2']))
    out = _ref_bn(_ref_conv(out, params['conv3_w'][None, None], 1, 0), params['bn3'])
    if 'sc_conv_w' in params:
        identity = _ref_bn(_ref_conv(x, params['sc_conv_w'][None, None], stride, 0),
                           params['sc_bn'])
    else:
        identity = x
    out = jax.nn.relu(out + identity)
    return jnp.transpose(out, (0, 3, 1, 2))


# ------------------------------- parameter init ---------------------------------

def init_bottleneck_params(key, in_planes, planes, stride):
    ks = jax.random.split(key, 12)

    def conv_w(k, cin, cout, ksz):
        std = math.sqrt(2.0 / (cin * ksz * ksz))            # kaiming_normal_
        shape = (cin, cout) if ksz == 1 else (ksz, ksz, cin, cout)
        return jax.random.normal(k, shape, jnp.float32) * std

    def bn_p(kg, kb, c):
        return dict(gamma=jax.random.uniform(kg, (c,), jnp.float32, 0.8, 1.2),
                    beta=jax.random.normal(kb, (c,), jnp.float32) * 0.05,
                    mean=jnp.zeros((c,), jnp.float32),
                    var=jnp.ones((c,), jnp.float32))

    p = {
        'conv1_w': conv_w(ks[0], in_planes, planes, 1),
        'bn1': bn_p(ks[1], ks[2], planes),
        'conv2_w': conv_w(ks[3], planes, planes, 3),
        'bn2': bn_p(ks[4], ks[5], planes),
        'conv3_w': conv_w(ks[6], planes, EXPANSION * planes, 1),
        'bn3': bn_p(ks[7], ks[8], EXPANSION * planes),
    }
    if stride != 1 or in_planes != EXPANSION * planes:
        p['sc_conv_w'] = conv_w(ks[9], in_planes, EXPANSION * planes, 1)
        p['sc_bn'] = bn_p(ks[10], ks[11], EXPANSION * planes)
    return p


# ------------------------------------- main --------------------------------------

def _check(y, y_ref, name):
    err = float(jnp.max(jnp.abs(y - y_ref)) / (jnp.max(jnp.abs(y_ref)) + 1e-6))
    assert err < 5e-2, f"{name}: rel-max-err={err:.4f}"


if __name__ == "__main__":
    key = jax.random.PRNGKey(0)
    k_pa, k_xa, k_pb, k_xb = jax.random.split(key, 4)

    fwd = jax.jit(bottleneck_forward, static_argnames=('stride',))

    # Block A: stride=2 with a projection shortcut (conv + BN); 3x3 uses im2col path.
    in_planes_a, planes_a, stride_a = 64, 32, 2
    params_a = init_bottleneck_params(k_pa, in_planes_a, planes_a, stride_a)
    xa = jax.random.normal(k_xa, (2, in_planes_a, 16, 16), jnp.float32)
    ya = jax.block_until_ready(fwd(xa, params_a, stride=stride_a))
    assert ya.shape == (2, EXPANSION * planes_a, 8, 8), ya.shape
    assert bool(jnp.all(jnp.isfinite(ya)))
    _check(ya, bottleneck_ref(xa, params_a, stride=stride_a), "stride2_block")

    # Block B: stride=1, identity shortcut; 3x3 uses the tap-folded kernel.
    in_planes_b, planes_b, stride_b = 128, 32, 1
    params_b = init_bottleneck_params(k_pb, in_planes_b, planes_b, stride_b)
    xb = jax.random.normal(k_xb, (2, in_planes_b, 16, 16), jnp.float32)
    yb = jax.block_until_ready(fwd(xb, params_b, stride=stride_b))
    assert yb.shape == (2, EXPANSION * planes_b, 16, 16), yb.shape
    assert bool(jnp.all(jnp.isfinite(yb)))
    _check(yb, bottleneck_ref(xb, params_b, stride=stride_b), "identity_block")

    print("KERNEL_OK")
</pallas_src>

<mosaic_0001>
module attributes {stable_mosaic.version = 11 : i64} {
  func.func @_mm1_kernel(%arg0: i32, %arg1: i32, %arg2: memref<256x64xbf16, #tpu.memory_space<vmem>>, %arg3: memref<64x128xbf16, #tpu.memory_space<vmem>>, %arg4: memref<1x128xf32, #tpu.memory_space<vmem>>, %arg5: memref<256x128xbf16, #tpu.memory_space<vmem>>) attributes {dimension_semantics = [#tpu.dimension_semantics<parallel>, #tpu.dimension_semantics<parallel>], iteration_bounds = array<i64: 2, 1>, scalar_prefetch = 0 : i64, scratch_operands = 0 : i64, tpu.core_type = #tpu.core_type<tc>, window_params = [{transform_indices = @transform_0, window_bounds = array<i64: 256, 64>}, {transform_indices = @transform_1, window_bounds = array<i64: 64, 128>}, {transform_indices = @transform_2, window_bounds = array<i64: 1, 128>}, {transform_indices = @transform_3, window_bounds = array<i64: 256, 128>}]} {
    %c0 = arith.constant 0 : index
    %c0_0 = arith.constant 0 : index
    %0 = vector.load %arg2[%c0, %c0_0] : memref<256x64xbf16, #tpu.memory_space<vmem>>, vector<256x64xbf16>
    %c0_1 = arith.constant 0 : index
    %c0_2 = arith.constant 0 : index
    %1 = vector.load %arg3[%c0_1, %c0_2] : memref<64x128xbf16, #tpu.memory_space<vmem>>, vector<64x128xbf16>
    %cst = arith.constant dense<0.000000e+00> : vector<256x128xf32>
    %2 = tpu.matmul %0, %1, %cst {dimension_numbers = #tpu.dot_dimension_numbers<[1], [0], [0], [1], [0, 0, 1, 1], [], []>} : vector<256x64xbf16>, vector<64x128xbf16>, vector<256x128xf32> -> vector<256x128xf32>
    %c0_3 = arith.constant 0 : index
    %c0_4 = arith.constant 0 : index
    %3 = vector.load %arg4[%c0_3, %c0_4] : memref<1x128xf32, #tpu.memory_space<vmem>>, vector<1x128xf32>
    %4 = vector.broadcast %3 : vector<1x128xf32> to vector<256x128xf32>
    %5 = arith.addf %2, %4 : vector<256x128xf32>
    %cst_5 = arith.constant 0.000000e+00 : f32
    %6 = vector.broadcast %cst_5 : f32 to vector<256x128xf32>
    %7 = arith.maximumf %5, %6 : vector<256x128xf32>
    %8 = arith.truncf %7 : vector<256x128xf32> to vector<256x128xbf16>
    %c0_6 = arith.constant 0 : index
    %c0_7 = arith.constant 0 : index
    %9 = vector.load %arg5[%c0_6, %c0_7] : memref<256x128xbf16, #tpu.memory_space<vmem>>, vector<256x128xbf16>
    tpu.vector_store %arg5[%c0_6, %c0_7], %8 {strides = array<i32>} : memref<256x128xbf16, #tpu.memory_space<vmem>>, vector<256x128xbf16>,
    return
  }
  func.func @transform_0(%arg0: i32, %arg1: i32) -> (i32, i32) {
    %c0_i32 = arith.constant 0 : i32
    %c0_i32_0 = arith.constant 0 : i32
    return %arg0, %c0_i32 : i32, i32
  }
  func.func @transform_1(%arg0: i32, %arg1: i32) -> (i32, i32) {
    %c0_i32 = arith.constant 0 : i32
    %c0_i32_0 = arith.constant 0 : i32
    return %c0_i32, %arg1 : i32, i32
  }
  func.func @transform_2(%arg0: i32, %arg1: i32) -> (i32, i32) {
    %c0_i32 = arith.constant 0 : i32
    %c0_i32_0 = arith.constant 0 : i32
    return %c0_i32, %arg1 : i32, i32
  }
  func.func @transform_3(%arg0: i32, %arg1: i32) -> (i32, i32) {
    %c0_i32 = arith.constant 0 : i32
    return %arg0, %arg1 : i32, i32
  }
}

module attributes {stable_mosaic.version = 11 : i64} {
  func.func @_mm1_kernel(%arg0: i32, %arg1: i32, %arg2: memref<128x1152xbf16, #tpu.memory_space<vmem>>, %arg3: memref<1152x128xbf16, #tpu.memory_space<vmem>>, %arg4: memref<1x128xf32, #tpu.memory_space<vmem>>, %arg5: memref<128x128xbf16, #tpu.memory_space<vmem>>) attributes {dimension_semantics = [#tpu.dimension_semantics<parallel>, #tpu.dimension_semantics<parallel>], iteration_bounds = array<i64: 1, 1>, scalar_prefetch = 0 : i64, scratch_operands = 0 : i64, tpu.core_type = #tpu.core_type<tc>, window_params = [{transform_indices = @transform_0, window_bounds = array<i64: 128, 1152>}, {transform_indices = @transform_1, window_bounds = array<i64: 1152, 128>}, {transform_indices = @transform_2, window_bounds = array<i64: 1, 128>}, {transform_indices = @transform_3, window_bounds = array<i64: 128, 128>}]} {
    %c0 = arith.constant 0 : index
    %c0_0 = arith.constant 0 : index
    %0 = vector.load %arg2[%c0, %c0_0] : memref<128x1152xbf16, #tpu.memory_space<vmem>>, vector<128x1152xbf16>
    %c0_1 = arith.constant 0 : index
    %c0_2 = arith.constant 0 : index
    %1 = vector.load %arg3[%c0_1, %c0_2] : memref<1152x128xbf16, #tpu.memory_space<vmem>>, vector<1152x128xbf16>
    %cst = arith.constant dense<0.000000e+00> : vector<128x128xf32>
    %2 = tpu.matmul %0, %1, %cst {dimension_numbers = #tpu.dot_dimension_numbers<[1], [0], [0], [1], [0, 0, 1, 1], [], []>} : vector<128x1152xbf16>, vector<1152x128xbf16>, vector<128x128xf32> -> vector<128x128xf32>
    %c0_3 = arith.constant 0 : index
    %c0_4 = arith.constant 0 : index
    %3 = vector.load %arg4[%c0_3, %c0_4] : memref<1x128xf32, #tpu.memory_space<vmem>>, vector<1x128xf32>
    %4 = vector.broadcast %3 : vector<1x128xf32> to vector<128x128xf32>
    %5 = arith.addf %2, %4 : vector<128x128xf32>
    %cst_5 = arith.constant 0.000000e+00 : f32
    %6 = vector.broadcast %cst_5 : f32 to vector<128x128xf32>
    %7 = arith.maximumf %5, %6 : vector<128x128xf32>
    %8 = arith.truncf %7 : vector<128x128xf32> to vector<128x128xbf16>
    %c0_6 = arith.constant 0 : index
    %c0_7 = arith.constant 0 : index
    %9 = vector.load %arg5[%c0_6, %c0_7] : memref<128x128xbf16, #tpu.memory_space<vmem>>, vector<128x128xbf16>
    tpu.vector_store %arg5[%c0_6, %c0_7], %8 {strides = array<i32>} : memref<128x128xbf16, #tpu.memory_space<vmem>>, vector<128x128xbf16>,
    return
  }
  func.func @transform_0(%arg0: i32, %arg1: i32) -> (i32, i32) {
    %c0_i32 = arith.constant 0 : i32
    %c0_i32_0 = arith.constant 0 : i32
    return %arg0, %c0_i32 : i32, i32
  }
  func.func @transform_1(%arg0: i32, %arg1: i32) -> (i32, i32) {
    %c0_i32 = arith.constant 0 : i32
    %c0_i32_0 = arith.constant 0 : i32
    return %c0_i32, %arg1 : i32, i32
  }
  func.func @transform_2(%arg0: i32, %arg1: i32) -> (i32, i32) {
    %c0_i32 = arith.constant 0 : i32
    %c0_i32_0 = arith.constant 0 : i32
    return %c0_i32, %arg1 : i32, i32
  }
  func.func @transform_3(%arg0: i32, %arg1: i32) -> (i32, i32) {
    %c0_i32 = arith.constant 0 : i32
    return %arg0, %arg1 : i32, i32
  }
}

module attributes {stable_mosaic.version = 11 : i64} {
  func.func @_mm1_kernel(%arg0: i32, %arg1: i32, %arg2: memref<128x64xbf16, #tpu.memory_space<vmem>>, %arg3: memref<64x128xbf16, #tpu.memory_space<vmem>>, %arg4: memref<1x128xf32, #tpu.memory_space<vmem>>, %arg5: memref<128x128xbf16, #tpu.memory_space<vmem>>) attributes {dimension_semantics = [#tpu.dimension_semantics<parallel>, #tpu.dimension_semantics<parallel>], iteration_bounds = array<i64: 1, 1>, scalar_prefetch = 0 : i64, scratch_operands = 0 : i64, tpu.core_type = #tpu.core_type<tc>, window_params = [{transform_indices = @transform_0, window_bounds = array<i64: 128, 64>}, {transform_indices = @transform_1, window_bounds = array<i64: 64, 128>}, {transform_indices = @transform_2, window_bounds = array<i64: 1, 128>}, {transform_indices = @transform_3, window_bounds = array<i64: 128, 128>}]} {
    %c0 = arith.constant 0 : index
    %c0_0 = arith.constant 0 : index
    %0 = vector.load %arg2[%c0, %c0_0] : memref<128x64xbf16, #tpu.memory_space<vmem>>, vector<128x64xbf16>
    %c0_1 = arith.constant 0 : index
    %c0_2 = arith.constant 0 : index
    %1 = vector.load %arg3[%c0_1, %c0_2] : memref<64x128xbf16, #tpu.memory_space<vmem>>, vector<64x128xbf16>
    %cst = arith.constant dense<0.000000e+00> : vector<128x128xf32>
    %2 = tpu.matmul %0, %1, %cst {dimension_numbers = #tpu.dot_dimension_numbers<[1], [0], [0], [1], [0, 0, 1, 1], [], []>} : vector<128x64xbf16>, vector<64x128xbf16>, vector<128x128xf32> -> vector<128x128xf32>
    %c0_3 = arith.constant 0 : index
    %c0_4 = arith.constant 0 : index
    %3 = vector.load %arg4[%c0_3, %c0_4] : memref<1x128xf32, #tpu.memory_space<vmem>>, vector<1x128xf32>
    %4 = vector.broadcast %3 : vector<1x128xf32> to vector<128x128xf32>
    %5 = arith.addf %2, %4 : vector<128x128xf32>
    %6 = arith.truncf %5 : vector<128x128xf32> to vector<128x128xbf16>
    %c0_5 = arith.constant 0 : index
    %c0_6 = arith.constant 0 : index
    %7 = vector.load %arg5[%c0_5, %c0_6] : memref<128x128xbf16, #tpu.memory_space<vmem>>, vector<128x128xbf16>
    tpu.vector_store %arg5[%c0_5, %c0_6], %6 {strides = array<i32>} : memref<128x128xbf16, #tpu.memory_space<vmem>>, vector<128x128xbf16>,
    return
  }
  func.func @transform_0(%arg0: i32, %arg1: i32) -> (i32, i32) {
    %c0_i32 = arith.constant 0 : i32
    %c0_i32_0 = arith.constant 0 : i32
    return %arg0, %c0_i32 : i32, i32
  }
  func.func @transform_1(%arg0: i32, %arg1: i32) -> (i32, i32) {
    %c0_i32 = arith.constant 0 : i32
    %c0_i32_0 = arith.constant 0 : i32
    return %c0_i32, %arg1 : i32, i32
  }
  func.func @transform_2(%arg0: i32, %arg1: i32) -> (i32, i32) {
    %c0_i32 = arith.constant 0 : i32
    %c0_i32_0 = arith.constant 0 : i32
    return %c0_i32, %arg1 : i32, i32
  }
  func.func @transform_3(%arg0: i32, %arg1: i32) -> (i32, i32) {
    %c0_i32 = arith.constant 0 : i32
    return %arg0, %arg1 : i32, i32
  }
}

module attributes {stable_mosaic.version = 11 : i64} {
  func.func @_mm1_kernel(%arg0: i32, %arg1: i32, %arg2: memref<128x128xbf16, #tpu.memory_space<vmem>>, %arg3: memref<128x128xbf16, #tpu.memory_space<vmem>>, %arg4: memref<1x128xf32, #tpu.memory_space<vmem>>, %arg5: memref<128x128xbf16, #tpu.memory_space<vmem>>, %arg6: memref<128x128xbf16, #tpu.memory_space<vmem>>) attributes {dimension_semantics = [#tpu.dimension_semantics<parallel>, #tpu.dimension_semantics<parallel>], iteration_bounds = array<i64: 1, 1>, scalar_prefetch = 0 : i64, scratch_operands = 0 : i64, tpu.core_type = #tpu.core_type<tc>, window_params = [{transform_indices = @transform_0, window_bounds = array<i64: 128, 128>}, {transform_indices = @transform_1, window_bounds = array<i64: 128, 128>}, {transform_indices = @transform_2, window_bounds = array<i64: 1, 128>}, {transform_indices = @transform_3, window_bounds = array<i64: 128, 128>}, {transform_indices = @transform_4, window_bounds = array<i64: 128, 128>}]} {
    %c0 = arith.constant 0 : index
    %c0_0 = arith.constant 0 : index
    %0 = vector.load %arg2[%c0, %c0_0] : memref<128x128xbf16, #tpu.memory_space<vmem>>, vector<128x128xbf16>
    %c0_1 = arith.constant 0 : index
    %c0_2 = arith.constant 0 : index
    %1 = vector.load %arg3[%c0_1, %c0_2] : memref<128x128xbf16, #tpu.memory_space<vmem>>, vector<128x128xbf16>
    %cst = arith.constant dense<0.000000e+00> : vector<128x128xf32>
    %2 = tpu.matmul %0, %1, %cst {dimension_numbers = #tpu.dot_dimension_numbers<[1], [0], [0], [1], [0, 0, 1, 1], [], []>} : vector<128x128xbf16>, vector<128x128xbf16>, vector<128x128xf32> -> vector<128x128xf32>
    %c0_3 = arith.constant 0 : index
    %c0_4 = arith.constant 0 : index
    %3 = vector.load %arg4[%c0_3, %c0_4] : memref<1x128xf32, #tpu.memory_space<vmem>>, vector<1x128xf32>
    %4 = vector.broadcast %3 : vector<1x128xf32> to vector<128x128xf32>
    %5 = arith.addf %2, %4 : vector<128x128xf32>
    %c0_5 = arith.constant 0 : index
    %c0_6 = arith.constant 0 : index
    %6 = vector.load %arg5[%c0_5, %c0_6] : memref<128x128xbf16, #tpu.memory_space<vmem>>, vector<128x128xbf16>
    %7 = arith.extf %6 : vector<128x128xbf16> to vector<128x128xf32>
    %8 = arith.addf %5, %7 : vector<128x128xf32>
    %cst_7 = arith.constant 0.000000e+00 : f32
    %9 = vector.broadcast %cst_7 : f32 to vector<128x128xf32>
    %10 = arith.maximumf %8, %9 : vector<128x128xf32>
    %11 = arith.truncf %10 : vector<128x128xf32> to vector<128x128xbf16>
    %c0_8 = arith.constant 0 : index
    %c0_9 = arith.constant 0 : index
    %12 = vector.load %arg6[%c0_8, %c0_9] : memref<128x128xbf16, #tpu.memory_space<vmem>>, vector<128x128xbf16>
    tpu.vector_store %arg6[%c0_8, %c0_9], %11 {strides = array<i32>} : memref<128x128xbf16, #tpu.memory_space<vmem>>, vector<128x128xbf16>,
    return
  }
  func.func @transform_0(%arg0: i32, %arg1: i32) -> (i32, i32) {
    %c0_i32 = arith.constant 0 : i32
    %c0_i32_0 = arith.constant 0 : i32
    return %arg0, %c0_i32 : i32, i32
  }
  func.func @transform_1(%arg0: i32, %arg1: i32) -> (i32, i32) {
    %c0_i32 = arith.constant 0 : i32
    %c0_i32_0 = arith.constant 0 : i32
    return %c0_i32, %arg1 : i32, i32
  }
  func.func @transform_2(%arg0: i32, %arg1: i32) -> (i32, i32) {
    %c0_i32 = arith.constant 0 : i32
    %c0_i32_0 = arith.constant 0 : i32
    return %c0_i32, %arg1 : i32, i32
  }
  func.func @transform_3(%arg0: i32, %arg1: i32) -> (i32, i32) {
    %c0_i32 = arith.constant 0 : i32
    return %arg0, %arg1 : i32, i32
  }
  func.func @transform_4(%arg0: i32, %arg1: i32) -> (i32, i32) {
    %c0_i32 = arith.constant 0 : i32
    return %arg0, %arg1 : i32, i32
  }
}

</mosaic_0001>

<bundles_post_ra>
// kernel: bottleneck_forward.4
= control target key start
LH: loop header
LB: loop body
LE: loop exit
PB: predicated region body
PF: predicated region fallthrough
CT: control target
= control target key end

     0   :  { %s1246_s12 = smov 0   ;;  %s1248_s13 = smov 0   ;;  %s1387_s0 = inlined_call_operand.vmem [shape: bf16[512,64], index: 0, kind: input, shape index: {}]   ;;  %s1388_s1 = inlined_call_operand.vmem [shape: bf16[64,128], index: 1, kind: input, shape index: {}]   ;;  %s1389_s2 = inlined_call_operand.vmem [shape: f32[1,128], index: 2, kind: input, shape index: {}]   ;;  %s1390_s3 = inlined_call_operand.vmem [shape: bf16[512,128], index: 3, kind: output, shape index: {}]  }
   0x1   :  { %s1250_s14 = smov 0  }
   0x2 LB: > { %s25_s15 = sadd.s32 1, %s1220_s13  ;;  %p887_p0 = scmp.ge.s32.totalorder %s1224_s14, 1  ;;  %s1224_s14 = sphi %s1250_s14, %s13_s14   ;;  %s1220_s13 = sphi %s1248_s13, %s1392_s13   ;;  %s1216_s12 = sphi %s1246_s12, %s1391_s12  }
   0x3   : > { %p27_p1 = scmp.ge.s32.totalorder %s25_s15, 2  ;;  %p169_p2 = scmp.lt.s32.totalorder %s1224_s14, 3 }
   0x5   : > { %s1394_s15 = smov (%p27_p1, %s25_s15), 0  ;;  %p170_p3 = pnand %p887_p0, %p169_p2 }
   0x6   : > { %v1182_v0 = vld [vmem:[%s1388_s1] sm:$0xff] (!%p170_p3)   ;;  %s888_s18 = sshll.u32 (!%p170_p3), %s1216_s12, 5  ;;  %v1183_v1 = vld [vmem:[%s1388_s1 + $0x8] sm:$0xff] (!%p170_p3)   ;;  %v1184_v2 = vld [vmem:[%s1388_s1 + $0x10] sm:$0xff] (!%p170_p3)   ;;  %vm377_vm0 = vcmask (!%p170_p3), 523264  }
   0x7   : > { %173 = sbr.rel (%p170_p3) target bundleno = 269 (0x10d), region = 32  ;;  %p204_p4 = scmp.lt.s32.totalorder (!%p170_p3), %s888_s18, 63  ;;  %1110 = vmatprep.subr.bf16.mxu0 (!%p170_p3), %v1182_v0  ;;  %1150 = vmatprep.subr.bf16.mxu1 (!%p170_p3), %v1182_v0  ;;  %v1185_v3 = vld [vmem:[%s1388_s1 + $0x18] sm:$0xff] (!%p170_p3)   ;;  %v1321_v20 = vld [vmem:[%s1389_s2] ss:$0 sm:$0xff] (!%p170_p3) }
   0x8   : > { %1111 = vmatpush3.bf16.msra.mxu0 (!%p170_p3), %v1182_v0  ;;  %1154 = vmatpush3.bf16.msra.mxu1 (!%p170_p3), %v1182_v0 }
   0x9   : > { %1112 = vmatprep.subr.bf16.mxu0 (!%p170_p3), %v1183_v1  ;;  %1151 = vmatprep.subr.bf16.mxu1 (!%p170_p3), %v1183_v1 }
   0xc   : > { %1113 = vmatpush3.bf16.msra.mxu0 (!%p170_p3), %v1183_v1  ;;  %1155 = vmatpush3.bf16.msra.mxu1 (!%p170_p3), %v1183_v1 }
   0xd   : > { %1114 = vmatprep.subr.bf16.mxu0 (!%p170_p3), %v1184_v2  ;;  %1152 = vmatprep.subr.bf16.mxu1 (!%p170_p3), %v1184_v2 }
   0xe   : > { %s1396_s18 = smov (!%p204_p4, %s888_s18), 63 }
   0xf   : > { %s889_s23 = sshll.u32 %s1396_s18, 2 }
  0x10   : > { %s1284_s28 = scalar_lea.vmem %s1387_s0, %s889_s23  ;;  %1115 = vmatpush3.bf16.msra.mxu0 %v1184_v2  ;;  %1156 = vmatpush3.bf16.msra.mxu1 %v1184_v2  ;;  %s1336_s6 = scalar_lea.vmem %s1390_s3, %s889_s23 }
  0x11   : > { %v1186_v4 = vld [vmem:[%s1284_s28] sm:$0xff]   ;;  %1116 = vmatprep.subr.bf16.mxu0 %v1185_v3  ;;  %1153 = vmatprep.subr.bf16.mxu1 %v1185_v3  ;;  %v1188_v6 = vld [vmem:[%s1284_s28 + $0x8] sm:$0xff]   ;;  %v1190_v8 = vld [vmem:[%s1284_s28 + $0x10] sm:$0xff]  }
  0x12   : > { %v1187_v5 = vld [vmem:[%s1284_s28 + $0x40] sm:$0xff]   ;;  %1118 = vmatprep.mubr.msk.bf16.mxu0 %vm377_vm0, %v1186_v4  ;;  %v1189_v7 = vld [vmem:[%s1284_s28 + $0x48] sm:$0xff]   ;;  %v1191_v9 = vld [vmem:[%s1284_s28 + $0x50] sm:$0xff]  }
  0x13   : > { %1134 = vmatprep.mubr.msk.bf16.mxu1 %vm377_vm0, %v1187_v5  ;;  %v1192_v10 = vld [vmem:[%s1284_s28 + $0x18] sm:$0xff]   ;;  %v1194_v12 = vld [vmem:[%s1284_s28 + $0x20] sm:$0xff]   ;;  %v1196_v14 = vld [vmem:[%s1284_s28 + $0x28] sm:$0xff]  }
  0x14   : > { %1117 = vmatpush3.bf16.msra.mxu0 %v1185_v3  ;;  %1157 = vmatpush3.bf16.msra.mxu1 %v1185_v3  ;;  %v1193_v11 = vld [vmem:[%s1284_s28 + $0x58] sm:$0xff]   ;;  %v1195_v13 = vld [vmem:[%s1284_s28 + $0x60] sm:$0xff]   ;;  %v1197_v15 = vld [vmem:[%s1284_s28 + $0x68] sm:$0xff]  }
  0x15   : > { %v1198_v16 = vld [vmem:[%s1284_s28 + $0x30] sm:$0xff]   ;;  %v1200_v18 = vld [vmem:[%s1284_s28 + $0x38] sm:$0xff]  }
  0x16   : > { %v1199_v17 = vld [vmem:[%s1284_s28 + $0x70] sm:$0xff]   ;;  %v1201_v19 = vld [vmem:[%s1284_s28 + $0x78] sm:$0xff]  }
  0x17   : > { %1119 = vmatmul.mubr.msk.bf16.vlgmr.msra.gmra.mrb[0].mxu0 %vm377_vm0, %v1188_v6  ;;  %1135 = vmatmul.mubr.msk.bf16.vlgmr.msra.gmra.mrb[0].mxu1 %vm377_vm0, %v1189_v7 }
  0x18   : > { %1122 = vmatprep.mubr.msk.bf16.mxu0 %vm377_vm0, %v1190_v8  ;;  %1138 = vmatprep.mubr.msk.bf16.mxu1 %vm377_vm0, %v1191_v9 }
  0x1f   : > { %1123 = vmatmul.mubr.msk.bf16.gmra.mrb[4].mxu0 %vm377_vm0, %v1192_v10  ;;  %1139 = vmatmul.mubr.msk.bf16.gmra.mrb[4].mxu1 %vm377_vm0, %v1193_v11 }
  0x20   : > { %1126 = vmatprep.mubr.msk.bf16.mxu0 %vm377_vm0, %v1194_v12  ;;  %1142 = vmatprep.mubr.msk.bf16.mxu1 %vm377_vm0, %v1195_v13 }
  0x27   : > { %1127 = vmatmul.mubr.msk.bf16.gmra.mrb[8].mxu0 %vm377_vm0, %v1196_v14  ;;  %1143 = vmatmul.mubr.msk.bf16.gmra.mrb[8].mxu1 %vm377_vm0, %v1197_v15 }
  0x28   : > { %1130 = vmatprep.mubr.msk.bf16.mxu0 %vm377_vm0, %v1198_v16  ;;  %1146 = vmatprep.mubr.msk.bf16.mxu1 %vm377_vm0, %v1199_v17 }
  0x2f   : > { %1131 = vmatmul.mubr.msk.bf16.gmra.mrb[12].mxu0 %vm377_vm0, %v1200_v18  ;;  %1147 = vmatmul.mubr.msk.bf16.gmra.mrb[12].mxu1 %vm377_vm0, %v1201_v19 }
  0xea   : > { %v1120_v21 = vpop.f32.mrb[0].mxu0  ;;  %v1136_v22 = vpop.f32.mrb[0].mxu1 }
  0xeb   : > { %v469_v23 = vadd.f32 %v1120_v21, %v1321_v20  ;;  %v533_v24 = vadd.f32 %v1136_v22, %v1321_v20  ;;  %v460_v25 = vpop.f32.mrb[1].mxu0  ;;  %v524_v26 = vpop.f32.mrb[1].mxu1 }
  0xec   : > { %v461_v27 = vadd.f32 %v1321_v20, %v460_v25  ;;  %v525_v28 = vadd.f32 %v1321_v20, %v524_v26  ;;  %v1121_v29 = vpop.f32.mrb[2].mxu0  ;;  %v1137_v30 = vpop.f32.mrb[2].mxu1 }
  0xed   : > { %v472_v31 = vadd.f32 %v1121_v29, %v1321_v20  ;;  %v536_v32 = vadd.f32 %v1137_v30, %v1321_v20  ;;  %v463_v33 = vpop.f32.mrb[3].mxu0  ;;  %v527_v34 = vpop.f32.mrb[3].mxu1  ;;  %v589_v37 = vmax.f32 %v469_v23, 0.0  ;;  %v605_v38 = vmax.f32 %v533_v24, 0.0 }
  0xee   : > { %v464_v35 = vadd.f32 %v1321_v20, %v463_v33  ;;  %v528_v36 = vadd.f32 %v1321_v20, %v527_v34  ;;  %v587_v41 = vmax.f32 %v461_v27, 0.0  ;;  %v603_v42 = vmax.f32 %v525_v28, 0.0 }
  0xef   : > { %v590_v39 = vmax.f32 %v472_v31, 0.0  ;;  %v606_v40 = vmax.f32 %v536_v32, 0.0 }
  0xf0   : > { %v588_v43 = vmax.f32 %v464_v35, 0.0  ;;  %v604_v44 = vmax.f32 %v528_v36, 0.0 }
  0xf1   : > { %v1003_v45 = vpack.c.bf16 %v590_v39, %v589_v37  ;;  %v1043_v46 = vpack.c.bf16 %v606_v40, %v605_v38 }
  0xf2   : > { %v998_v47 = vpack.c.bf16 %v588_v43, %v587_v41  ;;  %v1038_v48 = vpack.c.bf16 %v604_v44, %v603_v42  ;;  %v1124_v49 = vpop.f32.mrb[4].mxu0  ;;  %v1140_v50 = vpop.f32.mrb[4].mxu1 }
  0xf3   : > { %1075 = vst [vmem:[%s1336_s6 + $0x8] sm:$0xff] %v1003_v45   ;;  %1083 = vst [vmem:[%s1336_s6 + $0x48] sm:$0xff] %v1043_v46   ;;  %v485_v51 = vadd.f32 %v1124_v49, %v1321_v20  ;;  %v549_v52 = vadd.f32 %v1140_v50, %v1321_v20  ;;  %v476_v53 = vpop.f32.mrb[5].mxu0  ;;  %v540_v54 = vpop.f32.mrb[5].mxu1 }
  0xf4   : > { %999 = vst [vmem:[%s1336_s6] sm:$0xff] %v998_v47   ;;  %1082 = vst [vmem:[%s1336_s6 + $0x40] sm:$0xff] %v1038_v48   ;;  %v477_v55 = vadd.f32 %v1321_v20, %v476_v53  ;;  %v541_v56 = vadd.f32 %v1321_v20, %v540_v54  ;;  %v1125_v57 = vpop.f32.mrb[6].mxu0  ;;  %v1141_v58 = vpop.f32.mrb[6].mxu1 }
  0xf5   : > { %v488_v59 = vadd.f32 %v1125_v57, %v1321_v20  ;;  %v552_v60 = vadd.f32 %v1141_v58, %v1321_v20  ;;  %v479_v61 = vpop.f32.mrb[7].mxu0  ;;  %v543_v62 = vpop.f32.mrb[7].mxu1  ;;  %v593_v1 = vmax.f32 %v485_v51, 0.0  ;;  %v609_v2 = vmax.f32 %v549_v52, 0.0 }
  0xf6   : > { %v480_v63 = vadd.f32 %v1321_v20, %v479_v61  ;;  %v544_v0 = vadd.f32 %v1321_v20, %v543_v62  ;;  %v591_v5 = vmax.f32 %v477_v55, 0.0  ;;  %v607_v6 = vmax.f32 %v541_v56, 0.0 }
  0xf7   : > { %v594_v3 = vmax.f32 %v488_v59, 0.0  ;;  %v610_v4 = vmax.f32 %v552_v60, 0.0 }
  0xf8   : > { %v592_v7 = vmax.f32 %v480_v63, 0.0  ;;  %v608_v8 = vmax.f32 %v544_v0, 0.0 }
  0xf9   : > { %v1013_v9 = vpack.c.bf16 %v594_v3, %v593_v1  ;;  %v1053_v10 = vpack.c.bf16 %v610_v4, %v609_v2 }
  0xfa   : > { %v1008_v11 = vpack.c.bf16 %v592_v7, %v591_v5  ;;  %v1048_v12 = vpack.c.bf16 %v608_v8, %v607_v6  ;;  %v1128_v13 = vpop.f32.mrb[8].mxu0  ;;  %v1144_v14 = vpop.f32.mrb[8].mxu1 }
  0xfb   : > { %1077 = vst [vmem:[%s1336_s6 + $0x18] sm:$0xff] %v1013_v9   ;;  %1085 = vst [vmem:[%s1336_s6 + $0x58] sm:$0xff] %v1053_v10   ;;  %v501_v15 = vadd.f32 %v1128_v13, %v1321_v20  ;;  %v565_v16 = vadd.f32 %v1144_v14, %v1321_v20  ;;  %v492_v17 = vpop.f32.mrb[9].mxu0  ;;  %v556_v18 = vpop.f32.mrb[9].mxu1 }
  0xfc   : > { %1076 = vst [vmem:[%s1336_s6 + $0x10] sm:$0xff] %v1008_v11   ;;  %1084 = vst [vmem:[%s1336_s6 + $0x50] sm:$0xff] %v1048_v12   ;;  %v493_v19 = vadd.f32 %v1321_v20, %v492_v17  ;;  %v557_v21 = vadd.f32 %v1321_v20, %v556_v18  ;;  %v1129_v22 = vpop.f32.mrb[10].mxu0  ;;  %v1145_v23 = vpop.f32.mrb[10].mxu1 }
  0xfd   : > { %v504_v24 = vadd.f32 %v1129_v22, %v1321_v20  ;;  %v568_v25 = vadd.f32 %v1145_v23, %v1321_v20  ;;  %v495_v26 = vpop.f32.mrb[11].mxu0  ;;  %v559_v27 = vpop.f32.mrb[11].mxu1  ;;  %v597_v30 = vmax.f32 %v501_v15, 0.0  ;;  %v613_v31 = vmax.f32 %v565_v16, 0.0 }
  0xfe   : > { %v496_v28 = vadd.f32 %v1321_v20, %v495_v26  ;;  %v560_v29 = vadd.f32 %v1321_v20, %v559_v27  ;;  %v595_v34 = vmax.f32 %v493_v19, 0.0  ;;  %v611_v35 = vmax.f32 %v557_v21, 0.0 }
  0xff   : > { %v598_v32 = vmax.f32 %v504_v24, 0.0  ;;  %v614_v33 = vmax.f32 %v568_v25, 0.0 }
 0x100   : > { %v596_v36 = vmax.f32 %v496_v28, 0.0  ;;  %v612_v37 = vmax.f32 %v560_v29, 0.0 }
 0x101   : > { %v1023_v38 = vpack.c.bf16 %v598_v32, %v597_v30  ;;  %v1063_v39 = vpack.c.bf16 %v614_v33, %v613_v31 }
 0x102   : > { %v1018_v40 = vpack.c.bf16 %v596_v36, %v595_v34  ;;  %v1058_v41 = vpack.c.bf16 %v612_v37, %v611_v35  ;;  %v1132_v42 = vpop.f32.mrb[12].mxu0  ;;  %v1148_v43 = vpop.f32.mrb[12].mxu1 }
 0x103   : > { %1079 = vst [vmem:[%s1336_s6 + $0x28] sm:$0xff] %v1023_v38   ;;  %1087 = vst [vmem:[%s1336_s6 + $0x68] sm:$0xff] %v1063_v39   ;;  %v517_v44 = vadd.f32 %v1132_v42, %v1321_v20  ;;  %v581_v45 = vadd.f32 %v1148_v43, %v1321_v20  ;;  %v508_v46 = vpop.f32.mrb[13].mxu0  ;;  %v572_v47 = vpop.f32.mrb[13].mxu1 }
 0x104   : > { %1078 = vst [vmem:[%s1336_s6 + $0x20] sm:$0xff] %v1018_v40   ;;  %1086 = vst [vmem:[%s1336_s6 + $0x60] sm:$0xff] %v1058_v41   ;;  %v509_v48 = vadd.f32 %v1321_v20, %v508_v46  ;;  %v573_v49 = vadd.f32 %v1321_v20, %v572_v47  ;;  %v1133_v50 = vpop.f32.mrb[14].mxu0  ;;  %v1149_v51 = vpop.f32.mrb[14].mxu1 }
 0x105   : > { %v520_v52 = vadd.f32 %v1133_v50, %v1321_v20  ;;  %v584_v53 = vadd.f32 %v1149_v51, %v1321_v20  ;;  %v511_v54 = vpop.f32.mrb[15].mxu0  ;;  %v575_v55 = vpop.f32.mrb[15].mxu1  ;;  %v601_v58 = vmax.f32 %v517_v44, 0.0  ;;  %v617_v59 = vmax.f32 %v581_v45, 0.0 }
 0x106   : > { %v512_v56 = vadd.f32 %v1321_v20, %v511_v54  ;;  %v576_v57 = vadd.f32 %v1321_v20, %v575_v55  ;;  %v599_v62 = vmax.f32 %v509_v48, 0.0  ;;  %v615_v63 = vmax.f32 %v573_v49, 0.0 }
 0x107   : > { %v602_v60 = vmax.f32 %v520_v52, 0.0  ;;  %v618_v61 = vmax.f32 %v584_v53, 0.0 }
 0x108   : > { %v600_v0 = vmax.f32 %v512_v56, 0.0  ;;  %v616_v1 = vmax.f32 %v576_v57, 0.0 }
 0x109   : > { %v1033_v2 = vpack.c.bf16 %v602_v60, %v601_v58  ;;  %v1073_v3 = vpack.c.bf16 %v618_v61, %v617_v59 }
 0x10a   : > { %v1028_v4 = vpack.c.bf16 %v600_v0, %v599_v62  ;;  %v1068_v5 = vpack.c.bf16 %v616_v1, %v615_v63 }
 0x10b   : > { %1081 = vst [vmem:[%s1336_s6 + $0x38] sm:$0xff] %v1033_v2   ;;  %1089 = vst [vmem:[%s1336_s6 + $0x78] sm:$0xff] %v1073_v3  }
 0x10c   : > { %1080 = vst [vmem:[%s1336_s6 + $0x30] sm:$0xff] %v1028_v4   ;;  %1088 = vst [vmem:[%s1336_s6 + $0x70] sm:$0xff] %v1068_v5  }
 0x10d PF: > { %s13_s14 = sadd.s32 1, %s1224_s14   ;;  %s1391_s12 = smov %s1220_s13 }
 0x10e   : > { %p10_p5 = scmp.ge.s32.totalorder %s13_s14, 4   ;;  %s1392_s13 = smov %s1394_s15 }
 0x110   :  { %12 = sbr.rel (!%p10_p5) target bundleno = 2 (0x2), region = 68 }

// kernel: bottleneck_forward.6
= control target key start
LH: loop header
LB: loop body
LE: loop exit
PB: predicated region body
PF: predicated region fallthrough
CT: control target
= control target key end

     0   :  { %vm110_vm0 = vcmask 523264   ;;  %s563_s1 = inlined_call_operand.vmem [shape: bf16[64,128], index: 1, kind: input, shape index: {}]   ;;  %s564_s0 = inlined_call_operand.vmem [shape: bf16[128,64], index: 0, kind: input, shape index: {}]   ;;  %s565_s2 = inlined_call_operand.vmem [shape: f32[1,128], index: 2, kind: input, shape index: {}]   ;;  %s566_s3 = inlined_call_operand.vmem [shape: bf16[128,128], index: 3, kind: output, shape index: {}]  }
   0x1   :  { %v460_v0 = vld [vmem:[%s563_s1] sm:$0xff]   ;;  %v461_v1 = vld [vmem:[%s563_s1 + $0x8] sm:$0xff]   ;;  %v462_v2 = vld [vmem:[%s563_s1 + $0x10] sm:$0xff]  }
   0x2   :  { %428 = vmatprep.subr.bf16.mxu0 %v460_v0  ;;  %452 = vmatprep.subr.bf16.mxu1 %v460_v0  ;;  %v464_v3 = vld [vmem:[%s564_s0] sm:$0xff]   ;;  %v463_v5 = vld [vmem:[%s563_s1 + $0x18] sm:$0xff]   ;;  %v466_v6 = vld [vmem:[%s564_s0 + $0x8] sm:$0xff]  }
   0x3   :  { %429 = vmatpush3.bf16.msra.mxu0 %v460_v0  ;;  %456 = vmatpush3.bf16.msra.mxu1 %v460_v0  ;;  %v465_v4 = vld [vmem:[%s564_s0 + $0x20] sm:$0xff]   ;;  %v467_v7 = vld [vmem:[%s564_s0 + $0x28] sm:$0xff]   ;;  %v468_v8 = vld [vmem:[%s564_s0 + $0x10] sm:$0xff]  }
   0x4   :  { %430 = vmatprep.subr.bf16.mxu0 %v461_v1  ;;  %453 = vmatprep.subr.bf16.mxu1 %v461_v1  ;;  %v469_v9 = vld [vmem:[%s564_s0 + $0x30] sm:$0xff]   ;;  %v470_v10 = vld [vmem:[%s564_s0 + $0x18] sm:$0xff]   ;;  %v316_v13 = vld [vmem:[%s565_s2] ss:$0 sm:$0xff] }
   0x5   :  { %436 = vmatprep.mubr.msk.bf16.mxu0 %vm110_vm0, %v464_v3  ;;  %444 = vmatprep.mubr.msk.bf16.mxu1 %vm110_vm0, %v465_v4  ;;  %v471_v11 = vld [vmem:[%s564_s0 + $0x38] sm:$0xff]  }
   0x7   :  { %431 = vmatpush3.bf16.msra.mxu0 %v461_v1  ;;  %457 = vmatpush3.bf16.msra.mxu1 %v461_v1 }
   0x8   :  { %432 = vmatprep.subr.bf16.mxu0 %v462_v2  ;;  %454 = vmatprep.subr.bf16.mxu1 %v462_v2 }
   0xb   :  { %433 = vmatpush3.bf16.msra.mxu0 %v462_v2  ;;  %458 = vmatpush3.bf16.msra.mxu1 %v462_v2 }
   0xc   :  { %434 = vmatprep.subr.bf16.mxu0 %v463_v5  ;;  %455 = vmatprep.subr.bf16.mxu1 %v463_v5 }
   0xf   :  { %435 = vmatpush3.bf16.msra.mxu0 %v463_v5  ;;  %459 = vmatpush3.bf16.msra.mxu1 %v463_v5 }
  0x12   :  { %437 = vmatmul.mubr.msk.bf16.vlgmr.msra.gmra.mrb[0].mxu0 %vm110_vm0, %v466_v6  ;;  %445 = vmatmul.mubr.msk.bf16.vlgmr.msra.gmra.mrb[0].mxu1 %vm110_vm0, %v467_v7 }
  0x13   :  { %440 = vmatprep.mubr.msk.bf16.mxu0 %vm110_vm0, %v468_v8  ;;  %448 = vmatprep.mubr.msk.bf16.mxu1 %vm110_vm0, %v469_v9 }
  0x1a   :  { %441 = vmatmul.mubr.msk.bf16.gmra.mrb[4].mxu0 %vm110_vm0, %v470_v10  ;;  %449 = vmatmul.mubr.msk.bf16.gmra.mrb[4].mxu1 %vm110_vm0, %v471_v11 }
  0xe5   :  { %v438_v12 = vpop.f32.mrb[0].mxu0  ;;  %v446_v14 = vpop.f32.mrb[0].mxu1 }
  0xe6   :  { %v169_v15 = vpop.f32.mrb[1].mxu0  ;;  %v201_v16 = vpop.f32.mrb[1].mxu1  ;;  %v178_v19 = vadd.f32 %v438_v12, %v316_v13  ;;  %v210_v20 = vadd.f32 %v446_v14, %v316_v13 }
  0xe7   :  { %v439_v17 = vpop.f32.mrb[2].mxu0  ;;  %v447_v18 = vpop.f32.mrb[2].mxu1  ;;  %v170_v25 = vadd.f32 %v316_v13, %v169_v15  ;;  %v202_v26 = vadd.f32 %v316_v13, %v201_v16 }
  0xe8   :  { %v181_v21 = vadd.f32 %v439_v17, %v316_v13  ;;  %v213_v22 = vadd.f32 %v447_v18, %v316_v13  ;;  %v172_v23 = vpop.f32.mrb[3].mxu0  ;;  %v204_v24 = vpop.f32.mrb[3].mxu1 }
  0xe9   :  { %v173_v27 = vadd.f32 %v316_v13, %v172_v23  ;;  %v205_v28 = vadd.f32 %v316_v13, %v204_v24 }
  0xea   :  { %v377_v29 = vpack.c.bf16 %v181_v21, %v178_v19  ;;  %v397_v30 = vpack.c.bf16 %v213_v22, %v210_v20 }
  0xeb   :  { %v372_v31 = vpack.c.bf16 %v173_v27, %v170_v25  ;;  %v392_v32 = vpack.c.bf16 %v205_v28, %v202_v26 }
  0xec   :  { %409 = vst [vmem:[%s566_s3 + $0x8] sm:$0xff] %v377_v29   ;;  %413 = vst [vmem:[%s566_s3 + $0x28] sm:$0xff] %v397_v30  }
  0xed   :  { %373 = vst [vmem:[%s566_s3] sm:$0xff] %v372_v31   ;;  %412 = vst [vmem:[%s566_s3 + $0x20] sm:$0xff] %v392_v32   ;;  %v442_v33 = vpop.f32.mrb[4].mxu0  ;;  %v450_v34 = vpop.f32.mrb[4].mxu1 }
  0xee   :  { %v185_v35 = vpop.f32.mrb[5].mxu0  ;;  %v217_v36 = vpop.f32.mrb[5].mxu1  ;;  %v194_v39 = vadd.f32 %v442_v33, %v316_v13  ;;  %v226_v40 = vadd.f32 %v450_v34, %v316_v13 }
  0xef   :  { %v443_v37 = vpop.f32.mrb[6].mxu0  ;;  %v451_v38 = vpop.f32.mrb[6].mxu1  ;;  %v186_v45 = vadd.f32 %v316_v13, %v185_v35  ;;  %v218_v46 = vadd.f32 %v316_v13, %v217_v36 }
  0xf0   :  { %v197_v41 = vadd.f32 %v443_v37, %v316_v13  ;;  %v229_v42 = vadd.f32 %v451_v38, %v316_v13  ;;  %v188_v43 = vpop.f32.mrb[7].mxu0  ;;  %v220_v44 = vpop.f32.mrb[7].mxu1 }
  0xf1   :  { %v189_v47 = vadd.f32 %v316_v13, %v188_v43  ;;  %v221_v48 = vadd.f32 %v316_v13, %v220_v44 }
  0xf2   :  { %v387_v49 = vpack.c.bf16 %v197_v41, %v194_v39  ;;  %v407_v50 = vpack.c.bf16 %v229_v42, %v226_v40 }
  0xf3   :  { %v382_v51 = vpack.c.bf16 %v189_v47, %v186_v45  ;;  %v402_v52 = vpack.c.bf16 %v221_v48, %v218_v46 }
  0xf4   :  { %411 = vst [vmem:[%s566_s3 + $0x18] sm:$0xff] %v387_v49   ;;  %415 = vst [vmem:[%s566_s3 + $0x38] sm:$0xff] %v407_v50  }
  0xf5   :  { %410 = vst [vmem:[%s566_s3 + $0x10] sm:$0xff] %v382_v51   ;;  %414 = vst [vmem:[%s566_s3 + $0x30] sm:$0xff] %v402_v52  }

// kernel: bottleneck_forward.7
= control target key start
LH: loop header
LB: loop body
LE: loop exit
PB: predicated region body
PF: predicated region fallthrough
CT: control target
= control target key end

     0   :  { %s771_s1 = inlined_call_operand.vmem [shape: bf16[128,128], index: 1, kind: input, shape index: {}]   ;;  %s772_s0 = inlined_call_operand.vmem [shape: bf16[128,128], index: 0, kind: input, shape index: {}]   ;;  %s773_s3 = inlined_call_operand.vmem [shape: bf16[128,128], index: 3, kind: input, shape index: {}]   ;;  %s774_s2 = inlined_call_operand.vmem [shape: f32[1,128], index: 2, kind: input, shape index: {}]   ;;  %s775_s4 = inlined_call_operand.vmem [shape: bf16[128,128], index: 4, kind: output, shape index: {}]  }
   0x1   :  { %v597_v0 = vld [vmem:[%s771_s1] sm:$0xff]   ;;  %v598_v1 = vld [vmem:[%s771_s1 + $0x8] sm:$0xff]   ;;  %v599_v2 = vld [vmem:[%s771_s1 + $0x10] sm:$0xff]  }
   0x2   :  { %549 = vmatprep.subr.bf16.mxu0 %v597_v0  ;;  %581 = vmatprep.subr.bf16.mxu1 %v597_v0  ;;  %v600_v3 = vld [vmem:[%s771_s1 + $0x18] sm:$0xff]   ;;  %v605_v4 = vld [vmem:[%s772_s0] sm:$0xff]   ;;  %v602_v7 = vld [vmem:[%s771_s1 + $0x28] sm:$0xff]  }
   0x3   :  { %550 = vmatpush3.bf16.msra.mxu0 %v597_v0  ;;  %589 = vmatpush3.bf16.msra.mxu1 %v597_v0  ;;  %v606_v5 = vld [vmem:[%s772_s0 + $0x20] sm:$0xff]   ;;  %v603_v8 = vld [vmem:[%s771_s1 + $0x30] sm:$0xff]   ;;  %v604_v9 = vld [vmem:[%s771_s1 + $0x38] sm:$0xff]  }
   0x4   :  { %551 = vmatprep.subr.bf16.mxu0 %v598_v1  ;;  %582 = vmatprep.subr.bf16.mxu1 %v598_v1  ;;  %v601_v6 = vld [vmem:[%s771_s1 + $0x20] sm:$0xff]   ;;  %v607_v10 = vld [vmem:[%s772_s0 + $0x8] sm:$0xff]   ;;  %v609_v12 = vld [vmem:[%s772_s0 + $0x10] sm:$0xff]  }
   0x5   :  { %565 = vmatprep.mubr.bf16.mxu0 %v605_v4  ;;  %573 = vmatprep.mubr.bf16.mxu1 %v606_v5  ;;  %v608_v11 = vld [vmem:[%s772_s0 + $0x28] sm:$0xff]   ;;  %v610_v13 = vld [vmem:[%s772_s0 + $0x30] sm:$0xff]   ;;  %v611_v14 = vld [vmem:[%s772_s0 + $0x18] sm:$0xff]  }
   0x6   :  { %v612_v15 = vld [vmem:[%s772_s0 + $0x38] sm:$0xff]   ;;  %v519_v16 = vld [vmem:[%s773_s3 + $0x8] sm:$0xff]   ;;  %v448_v18 = vld [vmem:[%s773_s3] sm:$0xff]  }
   0x7   :  { %552 = vmatpush3.bf16.msra.mxu0 %v598_v1  ;;  %590 = vmatpush3.bf16.msra.mxu1 %v598_v1  ;;  %v523_v17 = vld [vmem:[%s773_s3 + $0x28] sm:$0xff]   ;;  %v522_v19 = vld [vmem:[%s773_s3 + $0x20] sm:$0xff]   ;;  %v706_v21 = vld [vmem:[%s773_s3 + $0x18] sm:$0xff]   ;;  %v453_v23 = vunpack.c.l.bf16 %v519_v16  ;;  %v449_v25 = vunpack.c.l.bf16 %v448_v18  ;;  %v454_v31 = vunpack.c.h.bf16 %v519_v16  ;;  %v450_v33 = vunpack.c.h.bf16 %v448_v18 }
   0x8   :  { %553 = vmatprep.subr.bf16.mxu0 %v599_v2  ;;  %583 = vmatprep.subr.bf16.mxu1 %v599_v2  ;;  %v701_v20 = vld [vmem:[%s774_s2] ss:$0 sm:$0xff]  ;;  %v711_v22 = vld [vmem:[%s773_s3 + $0x38] sm:$0xff]   ;;  %v469_v24 = vunpack.c.l.bf16 %v523_v17  ;;  %v465_v26 = vunpack.c.l.bf16 %v522_v19  ;;  %v716_v27 = vld [vmem:[%s773_s3 + $0x10] sm:$0xff]   ;;  %v470_v32 = vunpack.c.h.bf16 %v523_v17  ;;  %v466_v34 = vunpack.c.h.bf16 %v522_v19 }
   0x9   :  { %v721_v28 = vld [vmem:[%s773_s3 + $0x30] sm:$0xff]   ;;  %v461_v39 = vunpack.c.l.bf16 %v706_v21  ;;  %v477_v40 = vunpack.c.l.bf16 %v711_v22  ;;  %v457_v45 = vunpack.c.l.bf16 %v716_v27  ;;  %v462_v59 = vunpack.c.h.bf16 %v706_v21 }
   0xa   :  { %v473_v46 = vunpack.c.l.bf16 %v721_v28  ;;  %v478_v60 = vunpack.c.h.bf16 %v711_v22  ;;  %v458_v63 = vunpack.c.h.bf16 %v716_v27  ;;  %v474_v0 = vunpack.c.h.bf16 %v721_v28 }
   0xb   :  { %554 = vmatpush3.bf16.msra.mxu0 %v599_v2  ;;  %591 = vmatpush3.bf16.msra.mxu1 %v599_v2 }
   0xc   :  { %555 = vmatprep.subr.bf16.mxu0 %v600_v3  ;;  %584 = vmatprep.subr.bf16.mxu1 %v600_v3 }
   0xf   :  { %556 = vmatpush3.bf16.msra.mxu0 %v600_v3  ;;  %592 = vmatpush3.bf16.msra.mxu1 %v600_v3 }
  0x10   :  { %557 = vmatprep.subr.bf16.mxu0 %v601_v6  ;;  %585 = vmatprep.subr.bf16.mxu1 %v601_v6 }
  0x13   :  { %558 = vmatpush3.bf16.msra.mxu0 %v601_v6  ;;  %593 = vmatpush3.bf16.msra.mxu1 %v601_v6 }
  0x14   :  { %559 = vmatprep.subr.bf16.mxu0 %v602_v7  ;;  %586 = vmatprep.subr.bf16.mxu1 %v602_v7 }
  0x17   :  { %560 = vmatpush3.bf16.msra.mxu0 %v602_v7  ;;  %594 = vmatpush3.bf16.msra.mxu1 %v602_v7 }
  0x18   :  { %561 = vmatprep.subr.bf16.mxu0 %v603_v8  ;;  %587 = vmatprep.subr.bf16.mxu1 %v603_v8 }
  0x1b   :  { %562 = vmatpush3.bf16.msra.mxu0 %v603_v8  ;;  %595 = vmatpush3.bf16.msra.mxu1 %v603_v8 }
  0x1c   :  { %563 = vmatprep.subr.bf16.mxu0 %v604_v9  ;;  %588 = vmatprep.subr.bf16.mxu1 %v604_v9 }
  0x1f   :  { %564 = vmatpush3.bf16.msra.mxu0 %v604_v9  ;;  %596 = vmatpush3.bf16.msra.mxu1 %v604_v9 }
  0x22   :  { %566 = vmatmul.mubr.bf16.vlgmr.msra.gmra.mrb[0].mxu0 %v607_v10  ;;  %574 = vmatmul.mubr.bf16.vlgmr.msra.gmra.mrb[0].mxu1 %v608_v11 }
  0x23   :  { %569 = vmatprep.mubr.bf16.mxu0 %v609_v12  ;;  %577 = vmatprep.mubr.bf16.mxu1 %v610_v13 }
  0x2a   :  { %570 = vmatmul.mubr.bf16.gmra.mrb[4].mxu0 %v611_v14  ;;  %578 = vmatmul.mubr.bf16.gmra.mrb[4].mxu1 %v612_v15 }
  0xf5   :  { %v567_v29 = vpop.f32.mrb[0].mxu0  ;;  %v575_v30 = vpop.f32.mrb[0].mxu1 }
  0xf6   :  { %v196_v35 = vadd.f32 %v567_v29, %v701_v20  ;;  %v228_v36 = vadd.f32 %v575_v30, %v701_v20  ;;  %v187_v37 = vpop.f32.mrb[1].mxu0  ;;  %v219_v38 = vpop.f32.mrb[1].mxu1 }
  0xf7   :  { %v188_v41 = vadd.f32 %v701_v20, %v187_v37  ;;  %v220_v42 = vadd.f32 %v701_v20, %v219_v38  ;;  %v568_v43 = vpop.f32.mrb[2].mxu0  ;;  %v576_v44 = vpop.f32.mrb[2].mxu1 }
  0xf8   :  { %v284_v47 = vadd.f32 %v453_v23, %v196_v35  ;;  %v292_v48 = vadd.f32 %v469_v24, %v228_v36  ;;  %v199_v49 = vadd.f32 %v568_v43, %v701_v20  ;;  %v231_v50 = vadd.f32 %v576_v44, %v701_v20  ;;  %v190_v51 = vpop.f32.mrb[3].mxu0  ;;  %v222_v52 = vpop.f32.mrb[3].mxu1 }
  0xf9   :  { %v282_v53 = vadd.f32 %v449_v25, %v188_v41  ;;  %v290_v54 = vadd.f32 %v465_v26, %v220_v42  ;;  %v191_v55 = vadd.f32 %v701_v20, %v190_v51  ;;  %v223_v56 = vadd.f32 %v701_v20, %v222_v52 }
  0xfa   :  { %v285_v57 = vadd.f32 %v454_v31, %v199_v49  ;;  %v293_v58 = vadd.f32 %v470_v32, %v231_v50  ;;  %v300_v1 = vmax.f32 %v284_v47, 0.0  ;;  %v308_v2 = vmax.f32 %v292_v48, 0.0 }
  0xfb   :  { %v283_v61 = vadd.f32 %v450_v33, %v191_v55  ;;  %v291_v62 = vadd.f32 %v466_v34, %v223_v56  ;;  %v298_v5 = vmax.f32 %v282_v53, 0.0  ;;  %v306_v6 = vmax.f32 %v290_v54, 0.0 }
  0xfc   :  { %v301_v3 = vmax.f32 %v285_v57, 0.0  ;;  %v309_v4 = vmax.f32 %v293_v58, 0.0 }
  0xfd   :  { %v299_v7 = vmax.f32 %v283_v61, 0.0  ;;  %v307_v8 = vmax.f32 %v291_v62, 0.0  ;;  %v571_v9 = vpop.f32.mrb[4].mxu0  ;;  %v579_v10 = vpop.f32.mrb[4].mxu1 }
  0xfe   :  { %v487_v11 = vpack.c.bf16 %v301_v3, %v300_v1  ;;  %v507_v12 = vpack.c.bf16 %v309_v4, %v308_v2  ;;  %v212_v13 = vadd.f32 %v571_v9, %v701_v20  ;;  %v244_v14 = vadd.f32 %v579_v10, %v701_v20  ;;  %v203_v15 = vpop.f32.mrb[5].mxu0  ;;  %v235_v16 = vpop.f32.mrb[5].mxu1 }
  0xff   :  { %v482_v17 = vpack.c.bf16 %v299_v7, %v298_v5  ;;  %v502_v18 = vpack.c.bf16 %v307_v8, %v306_v6  ;;  %v204_v19 = vadd.f32 %v701_v20, %v203_v15  ;;  %v236_v21 = vadd.f32 %v701_v20, %v235_v16  ;;  %v572_v22 = vpop.f32.mrb[6].mxu0  ;;  %v580_v23 = vpop.f32.mrb[6].mxu1 }
 0x100   :  { %526 = vst [vmem:[%s775_s4 + $0x8] sm:$0xff] %v487_v11   ;;  %530 = vst [vmem:[%s775_s4 + $0x28] sm:$0xff] %v507_v12   ;;  %v288_v24 = vadd.f32 %v461_v39, %v212_v13  ;;  %v296_v25 = vadd.f32 %v477_v40, %v244_v14  ;;  %v215_v26 = vadd.f32 %v572_v22, %v701_v20  ;;  %v206_v28 = vpop.f32.mrb[7].mxu0  ;;  %v238_v29 = vpop.f32.mrb[7].mxu1 }
 0x101   :  { %v247_v27 = vadd.f32 %v580_v23, %v701_v20  ;;  %483 = vst [vmem:[%s775_s4] sm:$0xff] %v482_v17   ;;  %529 = vst [vmem:[%s775_s4 + $0x20] sm:$0xff] %v502_v18   ;;  %v286_v30 = vadd.f32 %v457_v45, %v204_v19  ;;  %v294_v31 = vadd.f32 %v473_v46, %v236_v21 }
 0x102   :  { %v207_v32 = vadd.f32 %v701_v20, %v206_v28  ;;  %v239_v33 = vadd.f32 %v701_v20, %v238_v29  ;;  %v289_v34 = vadd.f32 %v462_v59, %v215_v26  ;;  %v304_v38 = vmax.f32 %v288_v24, 0.0 }
 0x103   :  { %v297_v35 = vadd.f32 %v478_v60, %v247_v27  ;;  %v312_v39 = vmax.f32 %v296_v25, 0.0  ;;  %v302_v42 = vmax.f32 %v286_v30, 0.0  ;;  %v310_v43 = vmax.f32 %v294_v31, 0.0 }
 0x104   :  { %v287_v36 = vadd.f32 %v458_v63, %v207_v32  ;;  %v295_v37 = vadd.f32 %v474_v0, %v239_v33  ;;  %v305_v40 = vmax.f32 %v289_v34, 0.0 }
 0x105   :  { %v313_v41 = vmax.f32 %v297_v35, 0.0 }
 0x106   :  { %v303_v44 = vmax.f32 %v287_v36, 0.0  ;;  %v311_v47 = vmax.f32 %v295_v37, 0.0  ;;  %v497_v48 = vpack.c.bf16 %v305_v40, %v304_v38 }
 0x107   :  { %v517_v49 = vpack.c.bf16 %v313_v41, %v312_v39 }
 0x108   :  { %v492_v45 = vpack.c.bf16 %v303_v44, %v302_v42  ;;  %v512_v46 = vpack.c.bf16 %v311_v47, %v310_v43  ;;  %528 = vst [vmem:[%s775_s4 + $0x18] sm:$0xff] %v497_v48  }
 0x109   :  { %532 = vst [vmem:[%s775_s4 + $0x38] sm:$0xff] %v517_v49  }
 0x10a   :  { %527 = vst [vmem:[%s775_s4 + $0x10] sm:$0xff] %v492_v45   ;;  %531 = vst [vmem:[%s775_s4 + $0x30] sm:$0xff] %v512_v46  }

// kernel: bottleneck_forward.5
= control target key start
LH: loop header
LB: loop body
LE: loop exit
PB: predicated region body
PF: predicated region fallthrough
CT: control target
= control target key end

     0   :  { %s2926_s1 = inlined_call_operand.vmem [shape: bf16[1152,128], index: 1, kind: input, shape index: {}]   ;;  %s2927_s0 = inlined_call_operand.vmem [shape: bf16[128,1152], index: 0, kind: input, shape index: {}]   ;;  %s2928_s2 = inlined_call_operand.vmem [shape: f32[1,128], index: 2, kind: input, shape index: {}]   ;;  %s2929_s3 = inlined_call_operand.vmem [shape: bf16[128,128], index: 3, kind: output, shape index: {}]  }
   0x1   :  { %v2175_v0 = vld [vmem:[%s2926_s1 + $0x40] sm:$0xff]   ;;  %v2179_v4 = vld [vmem:[%s2926_s1 + $0x48] sm:$0xff]   ;;  %v2183_v8 = vld [vmem:[%s2926_s1 + $0x50] sm:$0xff]  }
   0x2   :  { %v2176_v1 = vld [vmem:[%s2926_s1 + $0xc0] sm:$0xff]   ;;  %1855 = vmatprep.subr.bf16.mxu0 %v2175_v0  ;;  %v2180_v5 = vld [vmem:[%s2926_s1 + $0xc8] sm:$0xff]   ;;  %v2184_v9 = vld [vmem:[%s2926_s1 + $0xd0] sm:$0xff]  }
   0x3   :  { %v2177_v2 = vld [vmem:[%s2926_s1] sm:$0xff]   ;;  %1919 = vmatprep.subr.bf16.mxu1 %v2176_v1  ;;  %v2181_v6 = vld [vmem:[%s2926_s1 + $0x8] sm:$0xff]   ;;  %v2185_v10 = vld [vmem:[%s2926_s1 + $0x10] sm:$0xff]  }
   0x4   :  { %v2178_v3 = vld [vmem:[%s2926_s1 + $0x80] sm:$0xff]   ;;  %1856 = vmatpush3.bf16.msra.mxu0 %v2177_v2  ;;  %v2182_v7 = vld [vmem:[%s2926_s1 + $0x88] sm:$0xff]   ;;  %v2186_v11 = vld [vmem:[%s2926_s1 + $0x90] sm:$0xff]  }
   0x5   :  { %1920 = vmatpush3.bf16.msra.mxu1 %v2178_v3  ;;  %1857 = vmatprep.subr.bf16.mxu0 %v2179_v4  ;;  %v2187_v12 = vld [vmem:[%s2926_s1 + $0x58] sm:$0xff]   ;;  %v2191_v16 = vld [vmem:[%s2926_s1 + $0x60] sm:$0xff]   ;;  %v2195_v20 = vld [vmem:[%s2926_s1 + $0x68] sm:$0xff]  }
   0x6   :  { %1921 = vmatprep.subr.bf16.mxu1 %v2180_v5  ;;  %v2188_v13 = vld [vmem:[%s2926_s1 + $0xd8] sm:$0xff]   ;;  %v2192_v17 = vld [vmem:[%s2926_s1 + $0xe0] sm:$0xff]   ;;  %v2196_v21 = vld [vmem:[%s2926_s1 + $0xe8] sm:$0xff]  }
   0x7   :  { %v2189_v14 = vld [vmem:[%s2926_s1 + $0x18] sm:$0xff]   ;;  %v2193_v18 = vld [vmem:[%s2926_s1 + $0x20] sm:$0xff]   ;;  %v2197_v22 = vld [vmem:[%s2926_s1 + $0x28] sm:$0xff]  }
   0x8   :  { %1858 = vmatpush3.bf16.msra.mxu0 %v2181_v6  ;;  %v2190_v15 = vld [vmem:[%s2926_s1 + $0x98] sm:$0xff]   ;;  %v2194_v19 = vld [vmem:[%s2926_s1 + $0xa0] sm:$0xff]   ;;  %v2198_v23 = vld [vmem:[%s2926_s1 + $0xa8] sm:$0xff]  }
   0x9   :  { %1922 = vmatpush3.bf16.msra.mxu1 %v2182_v7  ;;  %1859 = vmatprep.subr.bf16.mxu0 %v2183_v8  ;;  %v2199_v24 = vld [vmem:[%s2926_s1 + $0x70] sm:$0xff]   ;;  %v2203_v28 = vld [vmem:[%s2926_s1 + $0x78] sm:$0xff]   ;;  %v2207_v32 = vld [vmem:[%s2927_s0] ss:$36 sps:$4 sm:$0xff]  }
   0xa   :  { %1923 = vmatprep.subr.bf16.mxu1 %v2184_v9  ;;  %v2200_v25 = vld [vmem:[%s2926_s1 + $0xf0] sm:$0xff]   ;;  %v2204_v29 = vld [vmem:[%s2926_s1 + $0xf8] sm:$0xff]   ;;  %v2209_v33 = vld [vmem:[%s2927_s0 + $0x4] ss:$36 sps:$4 sm:$0xff]  }
   0xb   :  { %v2201_v26 = vld [vmem:[%s2926_s1 + $0x30] sm:$0xff]   ;;  %v2205_v30 = vld [vmem:[%s2926_s1 + $0x38] sm:$0xff]   ;;  %v2210_v34 = vld [vmem:[%s2927_s0 + $0x8] ss:$36 sps:$4 sm:$0xff]   ;;  %1078 = vmatprep.mubr.bf16.mxu0 %v2209_v33 }
   0xc   :  { %1860 = vmatpush3.bf16.msra.mxu0 %v2185_v10  ;;  %v2202_v27 = vld [vmem:[%s2926_s1 + $0xb0] sm:$0xff]   ;;  %v2206_v31 = vld [vmem:[%s2926_s1 + $0xb8] sm:$0xff]   ;;  %v2213_v36 = vld [vmem:[%s2926_s1 + $0x140] sm:$0xff]  }
   0xd   :  { %1924 = vmatpush3.bf16.msra.mxu1 %v2186_v11  ;;  %1861 = vmatprep.subr.bf16.mxu0 %v2187_v12  ;;  %v2212_v35 = vld [vmem:[%s2927_s0 + $0xc] ss:$36 sps:$4 sm:$0xff]   ;;  %v2214_v37 = vld [vmem:[%s2926_s1 + $0x1c0] sm:$0xff]   ;;  %v2219_v41 = vld [vmem:[%s2927_s0 + $0x54] ss:$36 sps:$4 sm:$0xff]  }
   0xe   :  { %1925 = vmatprep.subr.bf16.mxu1 %v2188_v13  ;;  %1175 = vmatprep.mubr.bf16.mxu1 %v2212_v35  ;;  %v2215_v38 = vld [vmem:[%s2926_s1 + $0x100] sm:$0xff]   ;;  %v2217_v40 = vld [vmem:[%s2927_s0 + $0x4c] ss:$36 sps:$4 sm:$0xff]   ;;  %v2227_v48 = vld [vmem:[%s2927_s0 + $0x94] ss:$36 sps:$4 sm:$0xff]  }
   0xf   :  { %v2216_v39 = vld [vmem:[%s2926_s1 + $0x180] sm:$0xff]   ;;  %v2221_v42 = vld [vmem:[%s2927_s0 + $0x48] ss:$36 sps:$4 sm:$0xff]   ;;  %v2222_v43 = vld [vmem:[%s2927_s0 + $0x50] ss:$36 sps:$4 sm:$0xff]  }
  0x10   :  { %1862 = vmatpush3.bf16.msra.mxu0 %v2189_v14  ;;  %v2223_v44 = vld [vmem:[%s2926_s1 + $0x148] sm:$0xff]   ;;  %v2229_v49 = vld [vmem:[%s2927_s0 + $0x9c] ss:$36 sps:$4 sm:$0xff]   ;;  %v2231_v50 = vld [vmem:[%s2927_s0 + $0x90] ss:$36 sps:$4 sm:$0xff]  }
  0x11   :  { %1926 = vmatpush3.bf16.msra.mxu1 %v2190_v15  ;;  %1863 = vmatprep.subr.bf16.mxu0 %v2191_v16  ;;  %v2224_v45 = vld [vmem:[%s2926_s1 + $0x1c8] sm:$0xff]   ;;  %v2232_v51 = vld [vmem:[%s2927_s0 + $0x98] ss:$36 sps:$4 sm:$0xff]   ;;  %v2233_v52 = vld [vmem:[%s2926_s1 + $0x150] sm:$0xff]  }
  0x12   :  { %1927 = vmatprep.subr.bf16.mxu1 %v2192_v17  ;;  %v2225_v46 = vld [vmem:[%s2926_s1 + $0x108] sm:$0xff]   ;;  %v2234_v53 = vld [vmem:[%s2926_s1 + $0x1d0] sm:$0xff]   ;;  %v2237_v56 = vld [vmem:[%s2927_s0 + $0xdc] ss:$36 sps:$4 sm:$0xff]  }
  0x13   :  { %v2226_v47 = vld [vmem:[%s2926_s1 + $0x188] sm:$0xff]   ;;  %v2235_v54 = vld [vmem:[%s2926_s1 + $0x110] sm:$0xff]   ;;  %v2241_v58 = vld [vmem:[%s2927_s0 + $0xd8] ss:$36 sps:$4 sm:$0xff]  }
  0x14   :  { %1864 = vmatpush3.bf16.msra.mxu0 %v2193_v18  ;;  %v2236_v55 = vld [vmem:[%s2926_s1 + $0x190] sm:$0xff]   ;;  %v2239_v57 = vld [vmem:[%s2927_s0 + $0xe4] ss:$36 sps:$4 sm:$0xff]   ;;  %v2243_v60 = vld [vmem:[%s2926_s1 + $0x158] sm:$0xff]  }
  0x15   :  { %1928 = vmatpush3.bf16.msra.mxu1 %v2194_v19  ;;  %1865 = vmatprep.subr.bf16.mxu0 %v2195_v20  ;;  %v2242_v59 = vld [vmem:[%s2927_s0 + $0xe0] ss:$36 sps:$4 sm:$0xff]   ;;  %v2244_v61 = vld [vmem:[%s2926_s1 + $0x1d8] sm:$0xff]   ;;  %v2249_v1 = vld [vmem:[%s2927_s0 + $0x12c] ss:$36 sps:$4 sm:$0xff]  }
  0x16   :  { %1929 = vmatprep.subr.bf16.mxu1 %v2196_v21  ;;  %v2245_v62 = vld [vmem:[%s2926_s1 + $0x118] sm:$0xff]   ;;  %v2247_v0 = vld [vmem:[%s2927_s0 + $0x124] ss:$36 sps:$4 sm:$0xff]   ;;  %v2257_v8 = vld [vmem:[%s2927_s0 + $0x16c] ss:$36 sps:$4 sm:$0xff]  }
  0x17   :  { %v2246_v63 = vld [vmem:[%s2926_s1 + $0x198] sm:$0xff]   ;;  %v2251_v2 = vld [vmem:[%s2927_s0 + $0x120] ss:$36 sps:$4 sm:$0xff]   ;;  %v2252_v4 = vld [vmem:[%s2927_s0 + $0x128] ss:$36 sps:$4 sm:$0xff]  }
  0x18   :  { %1866 = vmatpush3.bf16.msra.mxu0 %v2197_v22  ;;  %v2253_v3 = vld [vmem:[%s2926_s1 + $0x160] sm:$0xff]   ;;  %v2259_v9 = vld [vmem:[%s2927_s0 + $0x174] ss:$36 sps:$4 sm:$0xff]   ;;  %v2263_v10 = vld [vmem:[%s2926_s1 + $0x168] sm:$0xff]  }
  0x19   :  { %1930 = vmatpush3.bf16.msra.mxu1 %v2198_v23  ;;  %1867 = vmatprep.subr.bf16.mxu0 %v2199_v24  ;;  %v2254_v5 = vld [vmem:[%s2926_s1 + $0x1e0] sm:$0xff]   ;;  %v2264_v11 = vld [vmem:[%s2926_s1 + $0x1e8] sm:$0xff]   ;;  %v2262_v15 = vld [vmem:[%s2927_s0 + $0x170] ss:$36 sps:$4 sm:$0xff]  }
  0x1a   :  { %1931 = vmatprep.subr.bf16.mxu1 %v2200_v25  ;;  %v2255_v6 = vld [vmem:[%s2926_s1 + $0x120] sm:$0xff]   ;;  %v2261_v12 = vld [vmem:[%s2927_s0 + $0x168] ss:$36 sps:$4 sm:$0xff]   ;;  %v2267_v16 = vld [vmem:[%s2927_s0 + $0x1b4] ss:$36 sps:$4 sm:$0xff]  }
  0x1b   :  { %v2256_v7 = vld [vmem:[%s2926_s1 + $0x1a0] sm:$0xff]   ;;  %v2265_v13 = vld [vmem:[%s2926_s1 + $0x128] sm:$0xff]   ;;  %v2273_v18 = vld [vmem:[%s2926_s1 + $0x170] sm:$0xff]  }
  0x1c   :  { %1868 = vmatpush3.bf16.msra.mxu0 %v2201_v26  ;;  %v2266_v14 = vld [vmem:[%s2926_s1 + $0x1a8] sm:$0xff]   ;;  %v2269_v17 = vld [vmem:[%s2927_s0 + $0x1bc] ss:$36 sps:$4 sm:$0xff]   ;;  %v2274_v19 = vld [vmem:[%s2926_s1 + $0x1f0] sm:$0xff]  }
  0x1d   :  { %1932 = vmatpush3.bf16.msra.mxu1 %v2202_v27  ;;  %1869 = vmatprep.subr.bf16.mxu0 %v2203_v28  ;;  %v2275_v20 = vld [vmem:[%s2926_s1 + $0x130] sm:$0xff]   ;;  %v2272_v23 = vld [vmem:[%s2927_s0 + $0x1b8] ss:$36 sps:$4 sm:$0xff]   ;;  %v2279_v25 = vld [vmem:[%s2927_s0 + $0x204] ss:$36 sps:$4 sm:$0xff]  }
  0x1e   :  { %1933 = vmatprep.subr.bf16.mxu1 %v2204_v29  ;;  %v2276_v21 = vld [vmem:[%s2926_s1 + $0x1b0] sm:$0xff]   ;;  %v2277_v24 = vld [vmem:[%s2927_s0 + $0x1fc] ss:$36 sps:$4 sm:$0xff]  }
  0x1f   :  { %v2271_v22 = vld [vmem:[%s2927_s0 + $0x1b0] ss:$36 sps:$4 sm:$0xff]   ;;  %v2283_v26 = vld [vmem:[%s2926_s1 + $0x178] sm:$0xff]  }
  0x20   :  { %1870 = vmatpush3.bf16.msra.mxu0 %v2205_v30  ;;  %v2284_v27 = vld [vmem:[%s2926_s1 + $0x1f8] sm:$0xff]   ;;  %v2287_v35 = vld [vmem:[%s2927_s0 + $0x10] ss:$36 sps:$4 sm:$0xff]  }
  0x21   :  { %1934 = vmatpush3.bf16.msra.mxu1 %v2206_v31  ;;  %1983 = vmatprep.subr.bf16.mxu0 %v2213_v36  ;;  %v2285_v28 = vld [vmem:[%s2926_s1 + $0x138] sm:$0xff]   ;;  %v2282_v31 = vld [vmem:[%s2927_s0 + $0x200] ss:$36 sps:$4 sm:$0xff]  }
  0x22   :  { %2047 = vmatprep.subr.bf16.mxu1 %v2214_v37  ;;  %v2286_v29 = vld [vmem:[%s2926_s1 + $0x1b8] sm:$0xff]  }
  0x23   :  { %1079 = vmatmul.mubr.bf16.vlgmr.msra.gmra.mrb[0].mxu0 %v2207_v32  ;;  %v2281_v30 = vld [vmem:[%s2927_s0 + $0x1f8] ss:$36 sps:$4 sm:$0xff]   ;;  %v2293_v32 = vld [vmem:[%s2926_s1 + $0x200] sm:$0xff]  }
  0x24   :  { %1176 = vmatmul.mubr.bf16.vlgmr.msra.gmra.mrb[0].mxu1 %v2210_v34  ;;  %1984 = vmatpush3.bf16.msra.mxu0 %v2215_v38  ;;  %v2289_v33 = vld [vmem:[%s2927_s0 + $0x14] ss:$36 sps:$4 sm:$0xff]   ;;  %v2292_v34 = vld [vmem:[%s2927_s0 + $0x1c] ss:$36 sps:$4 sm:$0xff]   ;;  %v2296_v38 = vld [vmem:[%s2927_s0 + $0x64] ss:$36 sps:$4 sm:$0xff]  }
  0x25   :  { %2048 = vmatpush3.bf16.msra.mxu1 %v2216_v39  ;;  %1086 = vmatprep.mubr.bf16.mxu0 %v2217_v40  ;;  %v2290_v36 = vld [vmem:[%s2927_s0 + $0x18] ss:$36 sps:$4 sm:$0xff]   ;;  %v2300_v39 = vld [vmem:[%s2926_s1 + $0x208] sm:$0xff]   ;;  %v2307_v40 = vld [vmem:[%s2926_s1 + $0x210] sm:$0xff]  }
  0x26   :  { %1183 = vmatprep.mubr.bf16.mxu1 %v2219_v41  ;;  %1985 = vmatprep.subr.bf16.mxu0 %v2223_v44  ;;  %v2294_v37 = vld [vmem:[%s2927_s0 + $0x5c] ss:$36 sps:$4 sm:$0xff]   ;;  %v2303_v44 = vld [vmem:[%s2927_s0 + $0xac] ss:$36 sps:$4 sm:$0xff]  }
  0x27   :  { %2049 = vmatprep.subr.bf16.mxu1 %v2224_v45  ;;  %v2298_v41 = vld [vmem:[%s2927_s0 + $0x58] ss:$36 sps:$4 sm:$0xff]  }
  0x28   :  { %1986 = vmatpush3.bf16.msra.mxu0 %v2225_v46  ;;  %v2314_v45 = vld [vmem:[%s2926_s1 + $0x218] sm:$0xff]   ;;  %v2321_v46 = vld [vmem:[%s2926_s1 + $0x220] sm:$0xff]  }
  0x29   :  { %2050 = vmatpush3.bf16.msra.mxu1 %v2226_v47  ;;  %1987 = vmatprep.subr.bf16.mxu0 %v2233_v52  ;;  %v2305_v47 = vld [vmem:[%s2927_s0 + $0xa0] ss:$36 sps:$4 sm:$0xff]   ;;  %v2312_v52 = vld [vmem:[%s2927_s0 + $0xe8] ss:$36 sps:$4 sm:$0xff]  }
  0x2a   :  { %2051 = vmatprep.subr.bf16.mxu1 %v2234_v53  ;;  %v2335_v53 = vld [vmem:[%s2926_s1 + $0x230] sm:$0xff]  }
  0x2b   :  { %1087 = vmatmul.mubr.bf16.gmra.mrb[4].mxu0 %v2221_v42  ;;  %v2299_v42 = vld [vmem:[%s2927_s0 + $0x60] ss:$36 sps:$4 sm:$0xff]  }
  0x2c   :  { %1184 = vmatmul.mubr.bf16.gmra.mrb[4].mxu1 %v2222_v43  ;;  %1094 = vmatprep.mubr.bf16.mxu0 %v2227_v48  ;;  %v2301_v43 = vld [vmem:[%s2927_s0 + $0xa4] ss:$36 sps:$4 sm:$0xff]  }
  0x2d   :  { %1191 = vmatprep.mubr.bf16.mxu1 %v2229_v49  ;;  %1988 = vmatpush3.bf16.msra.mxu0 %v2235_v54  ;;  %v2306_v48 = vld [vmem:[%s2927_s0 + $0xa8] ss:$36 sps:$4 sm:$0xff]   ;;  %v2313_v54 = vld [vmem:[%s2927_s0 + $0xf0] ss:$36 sps:$4 sm:$0xff]  }
  0x2e   :  { %2052 = vmatpush3.bf16.msra.mxu1 %v2236_v55  ;;  %1989 = vmatprep.subr.bf16.mxu0 %v2243_v60  ;;  %v2308_v49 = vld [vmem:[%s2927_s0 + $0xec] ss:$36 sps:$4 sm:$0xff]   ;;  %v2315_v55 = vld [vmem:[%s2927_s0 + $0x134] ss:$36 sps:$4 sm:$0xff]   ;;  %v2322_v60 = vld [vmem:[%s2927_s0 + $0x17c] ss:$36 sps:$4 sm:$0xff]  }
  0x2f   :  { %2053 = vmatprep.subr.bf16.mxu1 %v2244_v61  ;;  %v2324_v61 = vld [vmem:[%s2927_s0 + $0x184] ss:$36 sps:$4 sm:$0xff]  }
  0x31   :  { %1990 = vmatpush3.bf16.msra.mxu0 %v2245_v62  ;;  %v2326_v62 = vld [vmem:[%s2927_s0 + $0x178] ss:$36 sps:$4 sm:$0xff]  }
  0x32   :  { %2054 = vmatpush3.bf16.msra.mxu1 %v2246_v63  ;;  %1991 = vmatprep.subr.bf16.mxu0 %v2253_v3  ;;  %v2327_v63 = vld [vmem:[%s2927_s0 + $0x180] ss:$36 sps:$4 sm:$0xff]   ;;  %v2334_v3 = vld [vmem:[%s2927_s0 + $0x1c8] ss:$36 sps:$4 sm:$0xff]  }
  0x33   :  { %1095 = vmatmul.mubr.bf16.gmra.mrb[8].mxu0 %v2231_v50  ;;  %2055 = vmatprep.subr.bf16.mxu1 %v2254_v5  ;;  %v2310_v50 = vld [vmem:[%s2927_s0 + $0xf4] ss:$36 sps:$4 sm:$0xff]  }
  0x34   :  { %1192 = vmatmul.mubr.bf16.gmra.mrb[8].mxu1 %v2232_v51  ;;  %1102 = vmatprep.mubr.bf16.mxu0 %v2237_v56  ;;  %v2328_v51 = vld [vmem:[%s2926_s1 + $0x228] sm:$0xff]   ;;  %v2317_v56 = vld [vmem:[%s2927_s0 + $0x13c] ss:$36 sps:$4 sm:$0xff]   ;;  %v2338_v5 = vld [vmem:[%s2927_s0 + $0x214] ss:$36 sps:$4 sm:$0xff]  }
  0x35   :  { %1199 = vmatprep.mubr.bf16.mxu1 %v2239_v57  ;;  %1992 = vmatpush3.bf16.msra.mxu0 %v2255_v6  ;;  %v2342_v57 = vld [vmem:[%s2926_s1 + $0x238] sm:$0xff]   ;;  %v2340_v6 = vld [vmem:[%s2927_s0 + $0x208] ss:$36 sps:$4 sm:$0xff]  }
  0x36   :  { %2056 = vmatpush3.bf16.msra.mxu1 %v2256_v7  ;;  %1993 = vmatprep.subr.bf16.mxu0 %v2263_v10  ;;  %v2341_v7 = vld [vmem:[%s2927_s0 + $0x210] ss:$36 sps:$4 sm:$0xff]   ;;  %v2345_v10 = vld [vmem:[%s2927_s0 + $0x68] ss:$36 sps:$4 sm:$0xff]  }
  0x37   :  { %2057 = vmatprep.subr.bf16.mxu1 %v2264_v11  ;;  %v2346_v11 = vld [vmem:[%s2927_s0 + $0x188] ss:$36 sps:$4 sm:$0xff]  }
  0x39   :  { %1994 = vmatpush3.bf16.msra.mxu0 %v2265_v13  ;;  %v2348_v13 = vld [vmem:[%s2927_s0 + $0x1d0] ss:$36 sps:$4 sm:$0xff]  }
  0x3a   :  { %2058 = vmatpush3.bf16.msra.mxu1 %v2266_v14  ;;  %1995 = vmatprep.subr.bf16.mxu0 %v2273_v18  ;;  %v2349_v14 = vld [vmem:[%s2927_s0 + $0xf8] ss:$36 sps:$4 sm:$0xff]   ;;  %v2806_v18 = vld [vmem:[%s2928_s2] ss:$0 sm:$0xff] }
  0x3b   :  { %1103 = vmatmul.mubr.bf16.gmra.mrb[12].mxu0 %v2241_v58  ;;  %2059 = vmatprep.subr.bf16.mxu1 %v2274_v19  ;;  %v2319_v58 = vld [vmem:[%s2927_s0 + $0x130] ss:$36 sps:$4 sm:$0xff]  }
  0x3c   :  { %1200 = vmatmul.mubr.bf16.gmra.mrb[12].mxu1 %v2242_v59  ;;  %1110 = vmatprep.mubr.bf16.mxu0 %v2247_v0  ;;  %v2320_v59 = vld [vmem:[%s2927_s0 + $0x138] ss:$36 sps:$4 sm:$0xff]   ;;  %v2329_v0 = vld [vmem:[%s2927_s0 + $0x1c4] ss:$36 sps:$4 sm:$0xff]  }
  0x3d   :  { %1207 = vmatprep.mubr.bf16.mxu1 %v2249_v1  ;;  %1996 = vmatpush3.bf16.msra.mxu0 %v2275_v20  ;;  %v2331_v1 = vld [vmem:[%s2927_s0 + $0x1cc] ss:$36 sps:$4 sm:$0xff]  }
  0x3e   :  { %2060 = vmatpush3.bf16.msra.mxu1 %v2276_v21  ;;  %1997 = vmatprep.subr.bf16.mxu0 %v2283_v26 }
  0x3f   :  { %2061 = vmatprep.subr.bf16.mxu1 %v2284_v27 }
  0x41   :  { %1998 = vmatpush3.bf16.msra.mxu0 %v2285_v28 }
  0x42   :  { %2062 = vmatpush3.bf16.msra.mxu1 %v2286_v29  ;;  %2127 = vmatprep.subr.bf16.mxu0 %v2293_v32 }
  0x43   :  { %1111 = vmatmul.mubr.bf16.gmra.mrb[16].mxu0 %v2251_v2  ;;  %2159 = vmatprep.subr.bf16.mxu1 %v2293_v32  ;;  %v2333_v2 = vld [vmem:[%s2927_s0 + $0x1c0] ss:$36 sps:$4 sm:$0xff]  }
  0x44   :  { %1208 = vmatmul.mubr.bf16.gmra.mrb[16].mxu1 %v2252_v4  ;;  %1118 = vmatprep.mubr.bf16.mxu0 %v2257_v8  ;;  %v2336_v4 = vld [vmem:[%s2927_s0 + $0x20c] ss:$36 sps:$4 sm:$0xff]   ;;  %v2343_v8 = vld [vmem:[%s2927_s0 + $0x20] ss:$36 sps:$4 sm:$0xff]  }
  0x45   :  { %1215 = vmatprep.mubr.bf16.mxu1 %v2259_v9  ;;  %v2344_v9 = vld [vmem:[%s2927_s0 + $0x140] ss:$36 sps:$4 sm:$0xff]  }
  0x4b   :  { %1119 = vmatmul.mubr.bf16.gmra.mrb[20].mxu0 %v2261_v12  ;;  %v2347_v12 = vld [vmem:[%s2927_s0 + $0xb0] ss:$36 sps:$4 sm:$0xff]  }
  0x4c   :  { %1216 = vmatmul.mubr.bf16.gmra.mrb[20].mxu1 %v2262_v15  ;;  %1126 = vmatprep.mubr.bf16.mxu0 %v2267_v16  ;;  %v2350_v15 = vld [vmem:[%s2927_s0 + $0x218] ss:$36 sps:$4 sm:$0xff]  }
  0x4d   :  { %1223 = vmatprep.mubr.bf16.mxu1 %v2269_v17 }
  0x53   :  { %1127 = vmatmul.mubr.bf16.gmra.mrb[24].mxu0 %v2271_v22 }
  0x54   :  { %1224 = vmatmul.mubr.bf16.gmra.mrb[24].mxu1 %v2272_v23  ;;  %1134 = vmatprep.mubr.bf16.mxu0 %v2277_v24 }
  0x55   :  { %1231 = vmatprep.mubr.bf16.mxu1 %v2279_v25 }
  0x5b   :  { %1135 = vmatmul.mubr.bf16.gmra.mrb[28].mxu0 %v2281_v30 }
  0x5c   :  { %1232 = vmatmul.mubr.bf16.gmra.mrb[28].mxu1 %v2282_v31  ;;  %1272 = vmatprep.mubr.bf16.mxu0 %v2289_v33 }
  0x5d   :  { %1369 = vmatprep.mubr.bf16.mxu1 %v2292_v34 }
  0x63   :  { %1273 = vmatmul.mubr.bf16.vlgmr.msra.gmra.mrb[32].mxu0 %v2287_v35 }
  0x64   :  { %1370 = vmatmul.mubr.bf16.vlgmr.msra.gmra.mrb[32].mxu1 %v2290_v36  ;;  %2128 = vmatpush3.bf16.msra.mxu0 %v2293_v32 }
  0x65   :  { %2167 = vmatpush3.bf16.msra.mxu1 %v2293_v32  ;;  %1280 = vmatprep.mubr.bf16.mxu0 %v2294_v37 }
  0x66   :  { %1377 = vmatprep.mubr.bf16.mxu1 %v2296_v38  ;;  %2129 = vmatprep.subr.bf16.mxu0 %v2300_v39 }
  0x67   :  { %2160 = vmatprep.subr.bf16.mxu1 %v2300_v39 }
  0x68   :  { %2130 = vmatpush3.bf16.msra.mxu0 %v2300_v39 }
  0x69   :  { %2168 = vmatpush3.bf16.msra.mxu1 %v2300_v39  ;;  %2131 = vmatprep.subr.bf16.mxu0 %v2307_v40 }
  0x6a   :  { %2161 = vmatprep.subr.bf16.mxu1 %v2307_v40 }
  0x6b   :  { %1281 = vmatmul.mubr.bf16.gmra.mrb[36].mxu0 %v2298_v41 }
  0x6c   :  { %1378 = vmatmul.mubr.bf16.gmra.mrb[36].mxu1 %v2299_v42  ;;  %1288 = vmatprep.mubr.bf16.mxu0 %v2301_v43 }
  0x6d   :  { %1385 = vmatprep.mubr.bf16.mxu1 %v2303_v44  ;;  %2132 = vmatpush3.bf16.msra.mxu0 %v2307_v40 }
  0x6e   :  { %2169 = vmatpush3.bf16.msra.mxu1 %v2307_v40  ;;  %2133 = vmatprep.subr.bf16.mxu0 %v2314_v45 }
  0x6f   :  { %2162 = vmatprep.subr.bf16.mxu1 %v2314_v45 }
  0x71   :  { %2134 = vmatpush3.bf16.msra.mxu0 %v2314_v45 }
  0x72   :  { %2170 = vmatpush3.bf16.msra.mxu1 %v2314_v45  ;;  %2135 = vmatprep.subr.bf16.mxu0 %v2321_v46 }
  0x73   :  { %1289 = vmatmul.mubr.bf16.gmra.mrb[40].mxu0 %v2305_v47  ;;  %2163 = vmatprep.subr.bf16.mxu1 %v2321_v46 }
  0x74   :  { %1386 = vmatmul.mubr.bf16.gmra.mrb[40].mxu1 %v2306_v48  ;;  %1296 = vmatprep.mubr.bf16.mxu0 %v2308_v49 }
  0x75   :  { %1393 = vmatprep.mubr.bf16.mxu1 %v2310_v50  ;;  %2136 = vmatpush3.bf16.msra.mxu0 %v2321_v46 }
  0x76   :  { %2171 = vmatpush3.bf16.msra.mxu1 %v2321_v46  ;;  %2137 = vmatprep.subr.bf16.mxu0 %v2328_v51 }
  0x77   :  { %2164 = vmatprep.subr.bf16.mxu1 %v2328_v51 }
  0x79   :  { %2138 = vmatpush3.bf16.msra.mxu0 %v2328_v51 }
  0x7a   :  { %2172 = vmatpush3.bf16.msra.mxu1 %v2328_v51  ;;  %2139 = vmatprep.subr.bf16.mxu0 %v2335_v53 }
  0x7b   :  { %1297 = vmatmul.mubr.bf16.gmra.mrb[44].mxu0 %v2312_v52  ;;  %2165 = vmatprep.subr.bf16.mxu1 %v2335_v53 }
  0x7c   :  { %1394 = vmatmul.mubr.bf16.gmra.mrb[44].mxu1 %v2313_v54  ;;  %1304 = vmatprep.mubr.bf16.mxu0 %v2315_v55 }
  0x7d   :  { %1401 = vmatprep.mubr.bf16.mxu1 %v2317_v56  ;;  %2140 = vmatpush3.bf16.msra.mxu0 %v2335_v53 }
  0x7e   :  { %2173 = vmatpush3.bf16.msra.mxu1 %v2335_v53  ;;  %2141 = vmatprep.subr.bf16.mxu0 %v2342_v57 }
  0x7f   :  { %2166 = vmatprep.subr.bf16.mxu1 %v2342_v57 }
  0x81   :  { %2142 = vmatpush3.bf16.msra.mxu0 %v2342_v57 }
  0x82   :  { %2174 = vmatpush3.bf16.msra.mxu1 %v2342_v57 }
  0x83   :  { %1305 = vmatmul.mubr.bf16.gmra.mrb[48].mxu0 %v2319_v58 }
  0x84   :  { %1402 = vmatmul.mubr.bf16.gmra.mrb[48].mxu1 %v2320_v59  ;;  %1312 = vmatprep.mubr.bf16.mxu0 %v2322_v60 }
  0x85   :  { %1409 = vmatprep.mubr.bf16.mxu1 %v2324_v61 }
  0x8b   :  { %1313 = vmatmul.mubr.bf16.gmra.mrb[52].mxu0 %v2326_v62 }
  0x8c   :  { %1410 = vmatmul.mubr.bf16.gmra.mrb[52].mxu1 %v2327_v63  ;;  %1320 = vmatprep.mubr.bf16.mxu0 %v2329_v0 }
  0x8d   :  { %1417 = vmatprep.mubr.bf16.mxu1 %v2331_v1 }
  0x93   :  { %1321 = vmatmul.mubr.bf16.gmra.mrb[56].mxu0 %v2333_v2 }
  0x94   :  { %1418 = vmatmul.mubr.bf16.gmra.mrb[56].mxu1 %v2334_v3  ;;  %1328 = vmatprep.mubr.bf16.mxu0 %v2336_v4 }
  0x95   :  { %1425 = vmatprep.mubr.bf16.mxu1 %v2338_v5 }
  0x9b   :  { %1329 = vmatmul.mubr.bf16.gmra.mrb[60].mxu0 %v2340_v6 }
  0x9c   :  { %1426 = vmatmul.mubr.bf16.gmra.mrb[60].mxu1 %v2341_v7  ;;  %2143 = vmatprep.mubr.bf16.mxu0 %v2343_v8 }
  0x9d   :  { %2151 = vmatprep.mubr.bf16.mxu1 %v2344_v9 }
  0xa3   :  { %2144 = vmatmul.mubr.bf16.vlgmr.msra.gmra.mrb[64].mxu0 %v2345_v10 }
  0xa4   :  { %2152 = vmatmul.mubr.bf16.vlgmr.msra.gmra.mrb[64].mxu1 %v2346_v11  ;;  %2147 = vmatprep.mubr.bf16.mxu0 %v2347_v12 }
  0xa5   :  { %2155 = vmatprep.mubr.bf16.mxu1 %v2348_v13 }
  0xab   :  { %2148 = vmatmul.mubr.bf16.gmra.mrb[68].mxu0 %v2349_v14 }
  0xac   :  { %2156 = vmatmul.mubr.bf16.gmra.mrb[68].mxu1 %v2350_v15 }
  0xf6   :  { %v1871_v16 = vpop.f32.mrb[0].mxu0 }
  0xf7   :  { %v1935_v17 = vpop.f32.mrb[0].mxu1  ;;  %v1872_v19 = vpop.f32.mrb[1].mxu0 }
  0xf8   :  { %v1873_v20 = vadd.f32 %v1872_v19, %v1871_v16  ;;  %v1936_v21 = vpop.f32.mrb[1].mxu1  ;;  %v1874_v22 = vpop.f32.mrb[2].mxu0 }
  0xf9   :  { %v1937_v23 = vadd.f32 %v1936_v21, %v1935_v17  ;;  %v1938_v24 = vpop.f32.mrb[2].mxu1  ;;  %v1875_v25 = vpop.f32.mrb[3].mxu0 }
  0xfa   :  { %v1081_v26 = vadd.f32 %v1873_v20, %v2806_v18  ;;  %v1876_v27 = vadd.f32 %v1875_v25, %v1874_v22  ;;  %v1939_v28 = vpop.f32.mrb[3].mxu1 }
  0xfb   :  { %v1940_v29 = vadd.f32 %v1939_v28, %v1938_v24 }
  0xfc   :  { %v2809_v30 = vadd.f32 %v1937_v23, %v1081_v26  ;;  %v1084_v31 = vadd.f32 %v1876_v27, %v2806_v18 }
  0xfe   :  { %v2812_v32 = vadd.f32 %v1940_v29, %v1084_v31  ;;  %v1877_v33 = vpop.f32.mrb[4].mxu0 }
  0xff   :  { %v1941_v34 = vpop.f32.mrb[4].mxu1  ;;  %v1878_v35 = vpop.f32.mrb[5].mxu0 }
 0x100   :  { %v1879_v36 = vadd.f32 %v1878_v35, %v1877_v33  ;;  %v1942_v37 = vpop.f32.mrb[5].mxu1  ;;  %v1880_v38 = vpop.f32.mrb[6].mxu0 }
 0x101   :  { %v1943_v39 = vadd.f32 %v1942_v37, %v1941_v34  ;;  %v1944_v40 = vpop.f32.mrb[6].mxu1  ;;  %v1881_v41 = vpop.f32.mrb[7].mxu0 }
 0x102   :  { %v1089_v42 = vadd.f32 %v1879_v36, %v2806_v18  ;;  %v1882_v43 = vadd.f32 %v1881_v41, %v1880_v38  ;;  %v1945_v44 = vpop.f32.mrb[7].mxu1 }
 0x103   :  { %v1946_v45 = vadd.f32 %v1945_v44, %v1944_v40 }
 0x104   :  { %v2815_v46 = vadd.f32 %v1943_v39, %v1089_v42  ;;  %v1092_v47 = vadd.f32 %v1882_v43, %v2806_v18 }
 0x106   :  { %v2818_v48 = vadd.f32 %v1946_v45, %v1092_v47  ;;  %v1883_v49 = vpop.f32.mrb[8].mxu0 }
 0x107   :  { %v1947_v50 = vpop.f32.mrb[8].mxu1  ;;  %v1884_v51 = vpop.f32.mrb[9].mxu0 }
 0x108   :  { %v1885_v52 = vadd.f32 %v1884_v51, %v1883_v49  ;;  %v1948_v53 = vpop.f32.mrb[9].mxu1  ;;  %v1886_v54 = vpop.f32.mrb[10].mxu0 }
 0x109   :  { %v1949_v55 = vadd.f32 %v1948_v53, %v1947_v50  ;;  %v1950_v56 = vpop.f32.mrb[10].mxu1  ;;  %v1887_v57 = vpop.f32.mrb[11].mxu0 }
 0x10a   :  { %v1097_v58 = vadd.f32 %v1885_v52, %v2806_v18  ;;  %v1888_v59 = vadd.f32 %v1887_v57, %v1886_v54  ;;  %v1951_v60 = vpop.f32.mrb[11].mxu1 }
 0x10b   :  { %v1952_v61 = vadd.f32 %v1951_v60, %v1950_v56 }
 0x10c   :  { %v2821_v62 = vadd.f32 %v1949_v55, %v1097_v58  ;;  %v1100_v63 = vadd.f32 %v1888_v59, %v2806_v18 }
 0x10e   :  { %v2824_v0 = vadd.f32 %v1952_v61, %v1100_v63  ;;  %v1889_v1 = vpop.f32.mrb[12].mxu0 }
 0x10f   :  { %v1953_v2 = vpop.f32.mrb[12].mxu1  ;;  %v1890_v3 = vpop.f32.mrb[13].mxu0 }
 0x110   :  { %v1891_v4 = vadd.f32 %v1890_v3, %v1889_v1  ;;  %v1954_v5 = vpop.f32.mrb[13].mxu1  ;;  %v1892_v6 = vpop.f32.mrb[14].mxu0 }
 0x111   :  { %v1955_v7 = vadd.f32 %v1954_v5, %v1953_v2  ;;  %v1956_v8 = vpop.f32.mrb[14].mxu1  ;;  %v1893_v9 = vpop.f32.mrb[15].mxu0 }
 0x112   :  { %v1105_v10 = vadd.f32 %v1891_v4, %v2806_v18  ;;  %v1894_v11 = vadd.f32 %v1893_v9, %v1892_v6  ;;  %v1957_v12 = vpop.f32.mrb[15].mxu1 }
 0x113   :  { %v1958_v13 = vadd.f32 %v1957_v12, %v1956_v8 }
 0x114   :  { %v2827_v14 = vadd.f32 %v1955_v7, %v1105_v10  ;;  %v1108_v15 = vadd.f32 %v1894_v11, %v2806_v18 }
 0x116   :  { %v2830_v16 = vadd.f32 %v1958_v13, %v1108_v15  ;;  %v1895_v17 = vpop.f32.mrb[16].mxu0 }
 0x117   :  { %v1959_v19 = vpop.f32.mrb[16].mxu1  ;;  %v1896_v20 = vpop.f32.mrb[17].mxu0 }
 0x118   :  { %v1897_v21 = vadd.f32 %v1896_v20, %v1895_v17  ;;  %v1960_v22 = vpop.f32.mrb[17].mxu1  ;;  %v1898_v23 = vpop.f32.mrb[18].mxu0 }
 0x119   :  { %v1961_v24 = vadd.f32 %v1960_v22, %v1959_v19  ;;  %v1962_v25 = vpop.f32.mrb[18].mxu1  ;;  %v1899_v26 = vpop.f32.mrb[19].mxu0 }
 0x11a   :  { %v1113_v27 = vadd.f32 %v1897_v21, %v2806_v18  ;;  %v1900_v28 = vadd.f32 %v1899_v26, %v1898_v23  ;;  %v1963_v29 = vpop.f32.mrb[19].mxu1 }
 0x11b   :  { %v1964_v31 = vadd.f32 %v1963_v29, %v1962_v25 }
 0x11c   :  { %v2833_v33 = vadd.f32 %v1961_v24, %v1113_v27  ;;  %v1116_v34 = vadd.f32 %v1900_v28, %v2806_v18 }
 0x11e   :  { %v2836_v35 = vadd.f32 %v1964_v31, %v1116_v34  ;;  %v1901_v36 = vpop.f32.mrb[20].mxu0 }
 0x11f   :  { %v1965_v37 = vpop.f32.mrb[20].mxu1  ;;  %v1902_v38 = vpop.f32.mrb[21].mxu0 }
 0x120   :  { %v1903_v39 = vadd.f32 %v1902_v38, %v1901_v36  ;;  %v1966_v40 = vpop.f32.mrb[21].mxu1  ;;  %v1904_v41 = vpop.f32.mrb[22].mxu0 }
 0x121   :  { %v1967_v42 = vadd.f32 %v1966_v40, %v1965_v37  ;;  %v1968_v43 = vpop.f32.mrb[22].mxu1  ;;  %v1905_v44 = vpop.f32.mrb[23].mxu0 }
 0x122   :  { %v1121_v45 = vadd.f32 %v1903_v39, %v2806_v18  ;;  %v1906_v47 = vadd.f32 %v1905_v44, %v1904_v41  ;;  %v1969_v49 = vpop.f32.mrb[23].mxu1 }
 0x123   :  { %v1970_v50 = vadd.f32 %v1969_v49, %v1968_v43 }
 0x124   :  { %v2839_v51 = vadd.f32 %v1967_v42, %v1121_v45  ;;  %v1124_v52 = vadd.f32 %v1906_v47, %v2806_v18 }
 0x126   :  { %v2842_v53 = vadd.f32 %v1970_v50, %v1124_v52  ;;  %v1907_v54 = vpop.f32.mrb[24].mxu0 }
 0x127   :  { %v1971_v55 = vpop.f32.mrb[24].mxu1  ;;  %v1908_v56 = vpop.f32.mrb[25].mxu0 }
 0x128   :  { %v1909_v57 = vadd.f32 %v1908_v56, %v1907_v54  ;;  %v1972_v58 = vpop.f32.mrb[25].mxu1  ;;  %v1910_v59 = vpop.f32.mrb[26].mxu0 }
 0x129   :  { %v1973_v60 = vadd.f32 %v1972_v58, %v1971_v55  ;;  %v1974_v61 = vpop.f32.mrb[26].mxu1  ;;  %v1911_v63 = vpop.f32.mrb[27].mxu0 }
 0x12a   :  { %v1129_v1 = vadd.f32 %v1909_v57, %v2806_v18  ;;  %v1912_v2 = vadd.f32 %v1911_v63, %v1910_v59  ;;  %v1975_v3 = vpop.f32.mrb[27].mxu1 }
 0x12b   :  { %v1976_v4 = vadd.f32 %v1975_v3, %v1974_v61 }
 0x12c   :  { %v2845_v5 = vadd.f32 %v1973_v60, %v1129_v1  ;;  %v1132_v6 = vadd.f32 %v1912_v2, %v2806_v18 }
 0x12e   :  { %v2848_v7 = vadd.f32 %v1976_v4, %v1132_v6  ;;  %v1913_v8 = vpop.f32.mrb[28].mxu0 }
 0x12f   :  { %v1977_v9 = vpop.f32.mrb[28].mxu1  ;;  %v1914_v10 = vpop.f32.mrb[29].mxu0 }
 0x130   :  { %v1915_v11 = vadd.f32 %v1914_v10, %v1913_v8  ;;  %v1978_v12 = vpop.f32.mrb[29].mxu1  ;;  %v1916_v13 = vpop.f32.mrb[30].mxu0 }
 0x131   :  { %v1979_v15 = vadd.f32 %v1978_v12, %v1977_v9  ;;  %v1980_v17 = vpop.f32.mrb[30].mxu1  ;;  %v1917_v19 = vpop.f32.mrb[31].mxu0 }
 0x132   :  { %v1137_v20 = vadd.f32 %v1915_v11, %v2806_v18  ;;  %v1918_v21 = vadd.f32 %v1917_v19, %v1916_v13  ;;  %v1981_v22 = vpop.f32.mrb[31].mxu1 }
 0x133   :  { %v1982_v23 = vadd.f32 %v1981_v22, %v1980_v17 }
 0x134   :  { %v2851_v24 = vadd.f32 %v1979_v15, %v1137_v20  ;;  %v1140_v25 = vadd.f32 %v1918_v21, %v2806_v18 }
 0x136   :  { %v2854_v26 = vadd.f32 %v1982_v23, %v1140_v25  ;;  %v1999_v27 = vpop.f32.mrb[32].mxu0 }
 0x137   :  { %v2063_v28 = vpop.f32.mrb[32].mxu1  ;;  %v2000_v29 = vpop.f32.mrb[33].mxu0 }
 0x138   :  { %v2001_v31 = vadd.f32 %v2000_v29, %v1999_v27  ;;  %v2064_v34 = vpop.f32.mrb[33].mxu1  ;;  %v2002_v36 = vpop.f32.mrb[34].mxu0 }
 0x139   :  { %v2065_v37 = vadd.f32 %v2064_v34, %v2063_v28  ;;  %v2066_v38 = vpop.f32.mrb[34].mxu1  ;;  %v2003_v39 = vpop.f32.mrb[35].mxu0 }
 0x13a   :  { %v1275_v40 = vadd.f32 %v2001_v31, %v2809_v30  ;;  %v2004_v41 = vadd.f32 %v2003_v39, %v2002_v36  ;;  %v2067_v42 = vpop.f32.mrb[35].mxu1 }
 0x13b   :  { %v2068_v43 = vadd.f32 %v2067_v42, %v2066_v38 }
 0x13c   :  { %v1278_v44 = vadd.f32 %v2004_v41, %v2812_v32  ;;  %v2858_v45 = vadd.f32 %v2065_v37, %v1275_v40 }
 0x13e   :  { %v2005_v18 = vpop.f32.mrb[36].mxu0  ;;  %v2860_v47 = vadd.f32 %v2068_v43, %v1278_v44 }
 0x13f   :  { %v2069_v49 = vpop.f32.mrb[36].mxu1  ;;  %v2006_v50 = vpop.f32.mrb[37].mxu0 }
 0x140   :  { %v2007_v52 = vadd.f32 %v2006_v50, %v2005_v18  ;;  %v2070_v54 = vpop.f32.mrb[37].mxu1  ;;  %v2008_v55 = vpop.f32.mrb[38].mxu0 }
 0x141   :  { %v2071_v56 = vadd.f32 %v2070_v54, %v2069_v49  ;;  %v2072_v57 = vpop.f32.mrb[38].mxu1  ;;  %v2009_v58 = vpop.f32.mrb[39].mxu0 }
 0x142   :  { %v1283_v30 = vadd.f32 %v2007_v52, %v2815_v46  ;;  %v2010_v59 = vadd.f32 %v2009_v58, %v2008_v55  ;;  %v2073_v60 = vpop.f32.mrb[39].mxu1 }
 0x143   :  { %v2074_v61 = vadd.f32 %v2073_v60, %v2072_v57 }
 0x144   :  { %v1286_v32 = vadd.f32 %v2010_v59, %v2818_v48  ;;  %v2864_v63 = vadd.f32 %v2071_v56, %v1283_v30 }
 0x146   :  { %v2011_v1 = vpop.f32.mrb[40].mxu0  ;;  %v2866_v2 = vadd.f32 %v2074_v61, %v1286_v32 }
 0x147   :  { %v2075_v3 = vpop.f32.mrb[40].mxu1  ;;  %v2012_v4 = vpop.f32.mrb[41].mxu0 }
 0x148   :  { %v2013_v6 = vadd.f32 %v2012_v4, %v2011_v1  ;;  %v2076_v8 = vpop.f32.mrb[41].mxu1  ;;  %v2014_v9 = vpop.f32.mrb[42].mxu0 }
 0x149   :  { %v2077_v10 = vadd.f32 %v2076_v8, %v2075_v3  ;;  %v2078_v11 = vpop.f32.mrb[42].mxu1  ;;  %v2015_v12 = vpop.f32.mrb[43].mxu0 }
 0x14a   :  { %v1291_v46 = vadd.f32 %v2013_v6, %v2821_v62  ;;  %v2016_v13 = vadd.f32 %v2015_v12, %v2014_v9  ;;  %v2079_v15 = vpop.f32.mrb[43].mxu1 }
 0x14b   :  { %v2080_v17 = vadd.f32 %v2079_v15, %v2078_v11 }
 0x14c   :  { %v1294_v48 = vadd.f32 %v2016_v13, %v2824_v0  ;;  %v2870_v19 = vadd.f32 %v2077_v10, %v1291_v46 }
 0x14e   :  { %v2017_v20 = vpop.f32.mrb[44].mxu0  ;;  %v2872_v21 = vadd.f32 %v2080_v17, %v1294_v48 }
 0x14f   :  { %v2081_v22 = vpop.f32.mrb[44].mxu1  ;;  %v2018_v23 = vpop.f32.mrb[45].mxu0 }
 0x150   :  { %v2019_v25 = vadd.f32 %v2018_v23, %v2017_v20  ;;  %v2082_v27 = vpop.f32.mrb[45].mxu1  ;;  %v2020_v28 = vpop.f32.mrb[46].mxu0 }
 0x151   :  { %v2083_v29 = vadd.f32 %v2082_v27, %v2081_v22  ;;  %v2084_v31 = vpop.f32.mrb[46].mxu1  ;;  %v2021_v34 = vpop.f32.mrb[47].mxu0 }
 0x152   :  { %v1299_v62 = vadd.f32 %v2019_v25, %v2827_v14  ;;  %v2022_v36 = vadd.f32 %v2021_v34, %v2020_v28  ;;  %v2085_v37 = vpop.f32.mrb[47].mxu1 }
 0x153   :  { %v2086_v38 = vadd.f32 %v2085_v37, %v2084_v31 }
 0x154   :  { %v1302_v0 = vadd.f32 %v2022_v36, %v2830_v16  ;;  %v2876_v39 = vadd.f32 %v2083_v29, %v1299_v62 }
 0x156   :  { %v2023_v40 = vpop.f32.mrb[48].mxu0  ;;  %v2878_v41 = vadd.f32 %v2086_v38, %v1302_v0 }
 0x157   :  { %v2087_v42 = vpop.f32.mrb[48].mxu1  ;;  %v2024_v43 = vpop.f32.mrb[49].mxu0 }
 0x158   :  { %v2025_v44 = vadd.f32 %v2024_v43, %v2023_v40  ;;  %v2088_v18 = vpop.f32.mrb[49].mxu1  ;;  %v2026_v49 = vpop.f32.mrb[50].mxu0 }
 0x159   :  { %v2089_v50 = vadd.f32 %v2088_v18, %v2087_v42  ;;  %v2090_v52 = vpop.f32.mrb[50].mxu1  ;;  %v2027_v54 = vpop.f32.mrb[51].mxu0 }
 0x15a   :  { %v1307_v14 = vadd.f32 %v2025_v44, %v2833_v33  ;;  %v2028_v55 = vadd.f32 %v2027_v54, %v2026_v49  ;;  %v2091_v56 = vpop.f32.mrb[51].mxu1 }
 0x15b   :  { %v2092_v57 = vadd.f32 %v2091_v56, %v2090_v52 }
 0x15c   :  { %v1310_v16 = vadd.f32 %v2028_v55, %v2836_v35  ;;  %v1404_v58 = vadd.f32 %v2089_v50, %v1307_v14 }
 0x15e   :  { %v2029_v30 = vpop.f32.mrb[52].mxu0  ;;  %v2882_v59 = vadd.f32 %v2092_v57, %v1310_v16 }
 0x15f   :  { %v2093_v60 = vpop.f32.mrb[52].mxu1  ;;  %v2030_v61 = vpop.f32.mrb[53].mxu0 }
 0x160   :  { %v2031_v32 = vadd.f32 %v2030_v61, %v2029_v30  ;;  %v2094_v1 = vpop.f32.mrb[53].mxu1  ;;  %v2032_v3 = vpop.f32.mrb[54].mxu0 }
 0x161   :  { %v2095_v4 = vadd.f32 %v2094_v1, %v2093_v60  ;;  %v2096_v6 = vpop.f32.mrb[54].mxu1  ;;  %v2033_v8 = vpop.f32.mrb[55].mxu0 }
 0x162   :  { %v1315_v9 = vadd.f32 %v2031_v32, %v2839_v51  ;;  %v2034_v33 = vadd.f32 %v2033_v8, %v2032_v3  ;;  %v2097_v10 = vpop.f32.mrb[55].mxu1 }
 0x163   :  { %v2098_v11 = vadd.f32 %v2097_v10, %v2096_v6 }
 0x164   :  { %v1318_v12 = vadd.f32 %v2034_v33, %v2842_v53  ;;  %v1412_v35 = vadd.f32 %v2095_v4, %v1315_v9 }
 0x166   :  { %v2035_v46 = vpop.f32.mrb[56].mxu0  ;;  %v1415_v13 = vadd.f32 %v2098_v11, %v1318_v12 }
 0x167   :  { %v2099_v15 = vpop.f32.mrb[56].mxu1  ;;  %v2036_v17 = vpop.f32.mrb[57].mxu0 }
 0x168   :  { %v2037_v48 = vadd.f32 %v2036_v17, %v2035_v46  ;;  %v2100_v20 = vpop.f32.mrb[57].mxu1  ;;  %v2038_v22 = vpop.f32.mrb[58].mxu0 }
 0x169   :  { %v2101_v23 = vadd.f32 %v2100_v20, %v2099_v15  ;;  %v2102_v25 = vpop.f32.mrb[58].mxu1  ;;  %v2039_v27 = vpop.f32.mrb[59].mxu0 }
 0x16a   :  { %v1323_v28 = vadd.f32 %v2037_v48, %v2845_v5  ;;  %v2040_v29 = vadd.f32 %v2039_v27, %v2038_v22  ;;  %v2103_v51 = vpop.f32.mrb[59].mxu1 }
 0x16b   :  { %v2104_v31 = vadd.f32 %v2103_v51, %v2102_v25 }
 0x16c   :  { %v1326_v34 = vadd.f32 %v2040_v29, %v2848_v7  ;;  %v1420_v62 = vadd.f32 %v2101_v23, %v1323_v28 }
 0x16e   :  { %v2041_v53 = vpop.f32.mrb[60].mxu0  ;;  %v2888_v36 = vadd.f32 %v2104_v31, %v1326_v34 }
 0x16f   :  { %v2105_v37 = vpop.f32.mrb[60].mxu1  ;;  %v2042_v38 = vpop.f32.mrb[61].mxu0 }
 0x170   :  { %v2043_v0 = vadd.f32 %v2042_v38, %v2041_v53  ;;  %v2106_v40 = vpop.f32.mrb[61].mxu1  ;;  %v2044_v42 = vpop.f32.mrb[62].mxu0 }
 0x171   :  { %v2107_v43 = vadd.f32 %v2106_v40, %v2105_v37  ;;  %v2108_v44 = vpop.f32.mrb[62].mxu1  ;;  %v2045_v18 = vpop.f32.mrb[63].mxu0 }
 0x172   :  { %v1331_v49 = vadd.f32 %v2043_v0, %v2851_v24  ;;  %v2046_v5 = vadd.f32 %v2045_v18, %v2044_v42  ;;  %v2109_v50 = vpop.f32.mrb[63].mxu1 }
 0x173   :  { %v2110_v52 = vadd.f32 %v2109_v50, %v2108_v44 }
 0x174   :  { %v1334_v54 = vadd.f32 %v2046_v5, %v2854_v26  ;;  %v1428_v7 = vadd.f32 %v2107_v43, %v1331_v49 }
 0x176   :  { %v2145_v14 = vpop.f32.mrb[64].mxu0  ;;  %v1431_v55 = vadd.f32 %v2110_v52, %v1334_v54 }
 0x177   :  { %v1477_v56 = vadd.f32 %v2145_v14, %v2864_v63  ;;  %v2153_v57 = vpop.f32.mrb[64].mxu1  ;;  %v1468_v16 = vpop.f32.mrb[65].mxu0 }
 0x178   :  { %v1509_v30 = vadd.f32 %v2153_v57, %v1412_v35  ;;  %v1469_v60 = vadd.f32 %v1468_v16, %v2858_v45  ;;  %v1500_v61 = vpop.f32.mrb[65].mxu1  ;;  %v2146_v32 = vpop.f32.mrb[66].mxu0 }
 0x179   :  { %v1501_v1 = vadd.f32 %v1500_v61, %v1404_v58  ;;  %v1480_v24 = vadd.f32 %v2146_v32, %v2866_v2  ;;  %v2154_v3 = vpop.f32.mrb[66].mxu1  ;;  %v1471_v4 = vpop.f32.mrb[67].mxu0  ;;  %v1533_v9 = vmax.f32 %v1477_v56, 0.0 }
 0x17a   :  { %v1512_v6 = vadd.f32 %v2154_v3, %v1415_v13  ;;  %v1472_v26 = vadd.f32 %v1471_v4, %v2860_v47  ;;  %v1503_v8 = vpop.f32.mrb[67].mxu1  ;;  %v1541_v10 = vmax.f32 %v1509_v30, 0.0  ;;  %v1531_v11 = vmax.f32 %v1469_v60, 0.0 }
 0x17b   :  { %v1534_v33 = vmax.f32 %v1480_v24, 0.0  ;;  %v1504_v63 = vadd.f32 %v1503_v8, %v2882_v59  ;;  %v1539_v45 = vmax.f32 %v1501_v1, 0.0 }
 0x17c   :  { %v1542_v12 = vmax.f32 %v1512_v6, 0.0  ;;  %v1532_v35 = vmax.f32 %v1472_v26, 0.0 }
 0x17d   :  { %v1816_v46 = vpack.c.bf16 %v1534_v33, %v1533_v9  ;;  %v1540_v15 = vmax.f32 %v1504_v63, 0.0 }
 0x17e   :  { %v1836_v58 = vpack.c.bf16 %v1542_v12, %v1541_v10  ;;  %v1811_v17 = vpack.c.bf16 %v1532_v35, %v1531_v11  ;;  %v2149_v2 = vpop.f32.mrb[68].mxu0 }
 0x17f   :  { %1848 = vst [vmem:[%s2929_s3 + $0x8] sm:$0xff] %v1816_v46   ;;  %v1831_v47 = vpack.c.bf16 %v1540_v15, %v1539_v45  ;;  %v1493_v13 = vadd.f32 %v2149_v2, %v2876_v39  ;;  %v2157_v48 = vpop.f32.mrb[68].mxu1  ;;  %v1484_v20 = vpop.f32.mrb[69].mxu0 }
 0x180   :  { %1852 = vst [vmem:[%s2929_s3 + $0x28] sm:$0xff] %v1836_v58   ;;  %1812 = vst [vmem:[%s2929_s3] sm:$0xff] %v1811_v17   ;;  %v1525_v59 = vadd.f32 %v2157_v48, %v1428_v7  ;;  %v1485_v22 = vadd.f32 %v1484_v20, %v2870_v19  ;;  %v1516_v23 = vpop.f32.mrb[69].mxu1  ;;  %v2150_v25 = vpop.f32.mrb[70].mxu0 }
 0x181   :  { %1851 = vst [vmem:[%s2929_s3 + $0x20] sm:$0xff] %v1831_v47   ;;  %v1517_v39 = vadd.f32 %v1516_v23, %v1420_v62  ;;  %v1496_v27 = vadd.f32 %v2150_v25, %v2878_v41  ;;  %v2158_v28 = vpop.f32.mrb[70].mxu1  ;;  %v1487_v29 = vpop.f32.mrb[71].mxu0  ;;  %v1537_v53 = vmax.f32 %v1493_v13, 0.0 }
 0x182   :  { %v1528_v51 = vadd.f32 %v2158_v28, %v1431_v55  ;;  %v1488_v31 = vadd.f32 %v1487_v29, %v2872_v21  ;;  %v1519_v34 = vpop.f32.mrb[71].mxu1  ;;  %v1545_v19 = vmax.f32 %v1525_v59, 0.0  ;;  %v1535_v0 = vmax.f32 %v1485_v22, 0.0 }
 0x183   :  { %v1538_v37 = vmax.f32 %v1496_v27, 0.0  ;;  %v1520_v38 = vadd.f32 %v1519_v34, %v2888_v36  ;;  %v1543_v43 = vmax.f32 %v1517_v39, 0.0 }
 0x184   :  { %v1546_v40 = vmax.f32 %v1528_v51, 0.0  ;;  %v1536_v42 = vmax.f32 %v1488_v31, 0.0 }
 0x185   :  { %v1826_v44 = vpack.c.bf16 %v1538_v37, %v1537_v53  ;;  %v1544_v18 = vmax.f32 %v1520_v38, 0.0 }
 0x186   :  { %v1846_v62 = vpack.c.bf16 %v1546_v40, %v1545_v19  ;;  %v1821_v49 = vpack.c.bf16 %v1536_v42, %v1535_v0 }
 0x187   :  { %1850 = vst [vmem:[%s2929_s3 + $0x18] sm:$0xff] %v1826_v44   ;;  %v1841_v41 = vpack.c.bf16 %v1544_v18, %v1543_v43 }
 0x188   :  { %1854 = vst [vmem:[%s2929_s3 + $0x38] sm:$0xff] %v1846_v62   ;;  %1849 = vst [vmem:[%s2929_s3 + $0x10] sm:$0xff] %v1821_v49  }
 0x189   :  { %1853 = vst [vmem:[%s2929_s3 + $0x30] sm:$0xff] %v1841_v41  }

</bundles_post_ra>
